<compile_context>
chip_gen: v7x
topology: tpu7x:2x2x1
jax: 0.10.0
libtpu: 0.0.40
codegen_flags: <defaults>
</compile_context>

<pallas_src>
import jax
import jax.numpy as jnp
from jax.experimental import pallas as pl
from jax.experimental.pallas import tpu as pltpu


# ---------------------------------------------------------------------------
# Kernels
# ---------------------------------------------------------------------------

def _make_gcn_kernel(tile_k):
    """GCNConv + ReLU row tile: out[i] = relu((sum_k A[i,k] @ X[k]) @ W + b).

    Grid = (row tile i [parallel], diagonal-span block k [arbitrary]).
    ks/ke (scalar-prefetched, SMEM) hold each row tile's first/last nonzero
    adjacency column block (A_hat is block diagonal for sorted batches).
    X is VMEM-resident; the needed (tile_k, d_in) slab is sliced dynamically.
    """
    def kernel(ks_ref, ke_ref, adj_ref, x_ref, w_ref, b_ref, out_ref, acc_ref):
        i = pl.program_id(0)
        k = pl.program_id(1)

        @pl.when(k == 0)
        def _():
            acc_ref[...] = jnp.zeros_like(acc_ref)

        # Only column blocks inside this row tile's diagonal span contribute.
        @pl.when(ks_ref[i] + k <= ke_ref[i])
        def _():
            kb = ks_ref[i] + k
            start = pl.multiple_of(kb * tile_k, tile_k)
            x_blk = x_ref[pl.ds(start, tile_k), :]          # resident X, no re-DMA
            acc_ref[...] += jnp.dot(adj_ref[...], x_blk,
                                    preferred_element_type=jnp.float32)

        @pl.when(k == pl.num_programs(1) - 1)
        def _():
            h = jnp.dot(acc_ref[...].astype(jnp.bfloat16), w_ref[...],
                        preferred_element_type=jnp.float32) + b_ref[...]
            out_ref[...] = jnp.maximum(h, 0.0).astype(out_ref.dtype)

    return kernel


def _make_gcn_pool_kernel(tile_k, g_pad):
    """Fused GCNConv + ReLU + per-graph masked max for one row tile.

    Emits this row tile's per-graph partial maxima (1, g_pad, hp).  Valid
    because h >= 0 post-ReLU and the one-hot mask zeroes padded / non-member
    rows, so max(h * mask_col) equals the max over member nodes.
    """
    def kernel(ks_ref, ke_ref, adj_ref, x_ref, w_ref, b_ref, mask_ref,
               out_ref, acc_ref):
        i = pl.program_id(0)
        k = pl.program_id(1)

        @pl.when(k == 0)
        def _():
            acc_ref[...] = jnp.zeros_like(acc_ref)

        @pl.when(ks_ref[i] + k <= ke_ref[i])
        def _():
            kb = ks_ref[i] + k
            start = pl.multiple_of(kb * tile_k, tile_k)
            x_blk = x_ref[pl.ds(start, tile_k), :]
            acc_ref[...] += jnp.dot(adj_ref[...], x_blk,
                                    preferred_element_type=jnp.float32)

        @pl.when(k == pl.num_programs(1) - 1)
        def _():
            h = jnp.dot(acc_ref[...].astype(jnp.bfloat16), w_ref[...],
                        preferred_element_type=jnp.float32) + b_ref[...]
            h = jnp.maximum(h, 0.0)                          # (tile_m, hp), >= 0
            # Per-graph masked max: one streaming (tile_m, hp) pass per graph
            # column instead of a (tile_m, g_pad, hp) broadcast (no vreg spill).
            # TODO(synk): for batches with many graphs, gate this loop with a
            # scalar-prefetched per-tile graph span; g_pad is small here.
            # TODO(synk): an empty graph pools to 0 (reference MaxAggregation
            # gives -inf); fine under the "every graph has >=1 node" invariant.
            gid = jax.lax.broadcasted_iota(jnp.int32, (g_pad, 1), 0)
            pooled = jnp.zeros((g_pad, h.shape[1]), jnp.float32)
            for g in range(g_pad):
                m_g = mask_ref[:, g:g + 1].astype(jnp.float32)      # (tile_m, 1)
                row = jnp.max(h * m_g, axis=0, keepdims=True)       # (1, hp)
                pooled = pooled + jnp.where(gid == g, row, 0.0)
            out_ref[...] = pooled[None]

    return kernel


def _head_kernel(part_ref, w3_ref, b3_ref, out_ref):
    """Final max over row-tile partials + Linear head (single grid step)."""
    pooled = jnp.max(part_ref[...], axis=0)                 # (g_pad, hp) f32
    out_ref[...] = (jnp.dot(pooled.astype(jnp.bfloat16), w3_ref[...],
                            preferred_element_type=jnp.float32) + b3_ref[...])


# ---------------------------------------------------------------------------
# pallas_call wrappers
# ---------------------------------------------------------------------------

def _round_up(v, m):
    return (v + m - 1) // m * m


def _vmem_limit_bytes(n_pad, tile_m, tile_k, d_in, d_out, g_pad):
    est = (2 * tile_m * tile_k * 2          # adjacency tiles (double buffered, bf16)
           + 2 * n_pad * d_in * 2           # resident X / h1 (bf16)
           + 2 * d_in * d_out * 2           # weights (bf16)
           + 2 * d_out * 4                  # bias (f32)
           + 2 * tile_m * g_pad * 2         # graph mask tile (layer 2)
           + 2 * max(tile_m * d_out * 2, g_pad * d_out * 4)   # output block
           + tile_m * d_in * 4)             # f32 accumulator scratch
    # Raise past v5e's 16 MiB scoped default; stay under v7x's 64 MiB physical.
    return int(min(max(est + (4 << 20), 16 << 20), 64 << 20))


def _gcn_layer(adj, x_full, w, b, ks, ke, k_span, *, tile_m, tile_k):
    n_pad = adj.shape[0]
    d_in = x_full.shape[1]
    d_out = w.shape[1]
    num_i = n_pad // tile_m

    def adj_map(i, k, ks, ke):
        # Clamp to the last in-span block: out-of-span steps keep the block
        # index unchanged, so the pipeline elides their DMA.
        return (i, jnp.minimum(ks[i] + k, ke[i]))

    grid_spec = pltpu.PrefetchScalarGridSpec(
        num_scalar_prefetch=2,
        grid=(num_i, k_span),
        in_specs=[
            pl.BlockSpec((tile_m, tile_k), adj_map),                   # A_hat tile
            pl.BlockSpec((n_pad, d_in), lambda i, k, ks, ke: (0, 0)),  # X resident
            pl.BlockSpec((d_in, d_out), lambda i, k, ks, ke: (0, 0)),  # W resident
            pl.BlockSpec((1, d_out), lambda i, k, ks, ke: (0, 0)),     # b resident
        ],
        out_specs=pl.BlockSpec((tile_m, d_out), lambda i, k, ks, ke: (i, 0)),
        scratch_shapes=[pltpu.VMEM((tile_m, d_in), jnp.float32)],
    )
    return pl.pallas_call(
        _make_gcn_kernel(tile_k),
        out_shape=jax.ShapeDtypeStruct((n_pad, d_out), jnp.bfloat16),
        grid_spec=grid_spec,
        compiler_params=pltpu.CompilerParams(
            dimension_semantics=("parallel", "arbitrary"),
            vmem_limit_bytes=_vmem_limit_bytes(n_pad, tile_m, tile_k,
                                               d_in, d_out, 8)),
    )(ks, ke, adj, x_full, w, b)


def _gcn_layer_pool(adj, h_full, w, b, mask, ks, ke, k_span, *, tile_m, tile_k):
    n_pad = adj.shape[0]
    d_in = h_full.shape[1]
    d_out = w.shape[1]
    g_pad = mask.shape[1]
    num_i = n_pad // tile_m

    def adj_map(i, k, ks, ke):
        return (i, jnp.minimum(ks[i] + k, ke[i]))

    grid_spec = pltpu.PrefetchScalarGridSpec(
        num_scalar_prefetch=2,
        grid=(num_i, k_span),
        in_specs=[
            pl.BlockSpec((tile_m, tile_k), adj_map),                   # A_hat tile
            pl.BlockSpec((n_pad, d_in), lambda i, k, ks, ke: (0, 0)),  # h1 resident
            pl.BlockSpec((d_in, d_out), lambda i, k, ks, ke: (0, 0)),  # W2 resident
            pl.BlockSpec((1, d_out), lambda i, k, ks, ke: (0, 0)),     # b2 resident
            pl.BlockSpec((tile_m, g_pad), lambda i, k, ks, ke: (i, 0)),  # graph mask
        ],
        out_specs=pl.BlockSpec((1, g_pad, d_out),
                               lambda i, k, ks, ke: (i, 0, 0)),
        scratch_shapes=[pltpu.VMEM((tile_m, d_in), jnp.float32)],
    )
    return pl.pallas_call(
        _make_gcn_pool_kernel(tile_k, g_pad),
        out_shape=jax.ShapeDtypeStruct((num_i, g_pad, d_out), jnp.float32),
        grid_spec=grid_spec,
        compiler_params=pltpu.CompilerParams(
            dimension_semantics=("parallel", "arbitrary"),
            vmem_limit_bytes=_vmem_limit_bytes(n_pad, tile_m, tile_k,
                                               d_in, d_out, g_pad)),
    )(ks, ke, adj, h_full, w, b, mask)


def _pool_head(partial, w3, b3):
    num_i, g_pad, hp = partial.shape
    ap = w3.shape[1]
    grid_spec = pltpu.PrefetchScalarGridSpec(
        num_scalar_prefetch=0,
        grid=(1,),
        in_specs=[
            pl.BlockSpec((num_i, g_pad, hp), lambda i: (0, 0, 0)),
            pl.BlockSpec((hp, ap), lambda i: (0, 0)),
            pl.BlockSpec((1, ap), lambda i: (0, 0)),
        ],
        out_specs=pl.BlockSpec((g_pad, ap), lambda i: (0, 0)),
    )
    return pl.pallas_call(
        _head_kernel,
        out_shape=jax.ShapeDtypeStruct((g_pad, ap), jnp.float32),
        grid_spec=grid_spec,
        compiler_params=pltpu.CompilerParams(
            dimension_semantics=("arbitrary",)),
    )(partial, w3, b3)


# ---------------------------------------------------------------------------
# Forward pass (padding / block-diagonal spans / glue)
# ---------------------------------------------------------------------------

def _block_column_spans(batch, num_nodes, num_graphs, n_pad, tile_m, tile_k):
    """Per adjacency row tile, first/last column block that can be nonzero.

    Assumes `batch` is sorted (torch_geometric batching convention), so A_hat
    is block diagonal in node order.  Fully-padded row tiles inherit the last
    graph's span (their adjacency rows are all zero anyway).
    """
    num_i = n_pad // tile_m
    tiles = jnp.arange(num_i)
    lo = jnp.minimum(tiles * tile_m, num_nodes - 1)
    hi = jnp.minimum((tiles + 1) * tile_m - 1, num_nodes - 1)
    gids = jnp.arange(num_graphs)
    g_first = jnp.searchsorted(batch, gids, side="left")
    g_last = jnp.searchsorted(batch, gids, side="right") - 1
    ks = (g_first[batch[lo]] // tile_k).astype(jnp.int32)
    ke = (g_last[batch[hi]] // tile_k).astype(jnp.int32)
    return ks, ke


def gcn_policy_forward(x, edge_index, edge_weight, batch, num_graphs,
                       w1, b1, w2, b2, w3, b3,
                       *, tile_m=512, tile_k=256, pad_dim=128):
    assert tile_m % tile_k == 0, "tile_m must be a multiple of tile_k"
    num_nodes, n_features = x.shape
    hidden = w1.shape[1]
    n_actions = w3.shape[1]

    n_pad = _round_up(num_nodes, tile_m)
    g_pad = _round_up(num_graphs, 8)
    fp = _round_up(n_features, pad_dim)
    hp = _round_up(hidden, pad_dim)
    ap = _round_up(n_actions, pad_dim)

    # Block-diagonal span skipping relies on torch_geometric's sorted batch.
    assert bool(jnp.all(batch[1:] >= batch[:-1])), "batch must be sorted by graph"

    # Dense normalized adjacency (gcn_norm with self loops), streamed as bf16.
    adj = build_normalized_adjacency(edge_index, edge_weight, num_nodes)
    adj = jnp.pad(adj, ((0, n_pad - num_nodes), (0, n_pad - num_nodes)))
    adj = adj.astype(jnp.bfloat16)

    x_p = jnp.pad(x, ((0, n_pad - num_nodes), (0, fp - n_features)))
    x_p = x_p.astype(jnp.bfloat16)

    def pad2(a, r, c, dtype):
        return jnp.pad(a, ((0, r - a.shape[0]), (0, c - a.shape[1]))).astype(dtype)

    w1_p, b1_p = pad2(w1, fp, hp, jnp.bfloat16), pad2(b1, 1, hp, jnp.float32)
    w2_p, b2_p = pad2(w2, hp, hp, jnp.bfloat16), pad2(b2, 1, hp, jnp.float32)
    w3_p, b3_p = pad2(w3, hp, ap, jnp.bfloat16), pad2(b3, 1, ap, jnp.float32)

    mask = build_graph_mask(batch, num_graphs)
    mask_p = jnp.pad(mask, ((0, n_pad - num_nodes), (0, g_pad - num_graphs)))
    mask_p = mask_p.astype(jnp.bfloat16)

    ks, ke = _block_column_spans(batch, num_nodes, num_graphs, n_pad,
                                 tile_m, tile_k)
    # Static bound on the per-row-tile diagonal span: the k grid only iterates
    # blocks that can be nonzero instead of all n_pad // tile_k column blocks.
    k_span = int(jnp.max(ke - ks)) + 1

    h1 = _gcn_layer(adj, x_p, w1_p, b1_p, ks, ke, k_span,
                    tile_m=tile_m, tile_k=tile_k)
    partial = _gcn_layer_pool(adj, h1, w2_p, b2_p, mask_p, ks, ke, k_span,
                              tile_m=tile_m, tile_k=tile_k)
    out = _pool_head(partial, w3_p, b3_p)

    # torch: x.squeeze()
    return jnp.squeeze(out[:num_graphs, :n_actions])


# ---------------- plain-JAX glue (graph -> dense operators) ----------------

def build_normalized_adjacency(edge_index, edge_weight, num_nodes):
    """torch_geometric gcn_norm with add_self_loops=True (dense A_hat, f32)."""
    row, col = edge_index[0], edge_index[1]            # row=source, col=target
    sl = jnp.arange(num_nodes, dtype=row.dtype)
    row = jnp.concatenate([row, sl])
    col = jnp.concatenate([col, sl])
    ew = jnp.concatenate([edge_weight,
                          jnp.ones((num_nodes,), dtype=edge_weight.dtype)])
    deg = jnp.zeros((num_nodes,), dtype=jnp.float32).at[col].add(ew)
    deg_inv_sqrt = jnp.where(deg > 0, 1.0 / jnp.sqrt(deg), 0.0)
    norm = deg_inv_sqrt[row] * ew * deg_inv_sqrt[col]
    # out[target] += norm * x[source]  =>  A_hat[target, source] = norm
    adj = jnp.zeros((num_nodes, num_nodes), dtype=jnp.float32).at[col, row].add(norm)
    return adj


def build_graph_mask(batch, num_graphs):
    # (num_nodes, num_graphs) one-hot membership
    return (batch[:, None] == jnp.arange(num_graphs)[None, :]).astype(jnp.float32)


def glorot(key, shape):
    fan_in, fan_out = shape[0], shape[1]
    limit = jnp.sqrt(6.0 / (fan_in + fan_out))
    return jax.random.uniform(key, shape, jnp.float32, -limit, limit)


def jax_reference(adj, x, mask, w1, b1, w2, b2, w3, b3):
    h1 = jnp.maximum(adj @ (x @ w1) + b1, 0.0)
    h2 = jnp.maximum(adj @ (h1 @ w2) + b2, 0.0)
    pooled = jnp.max(
        jnp.where(mask.T[:, :, None] > 0, h2[None, :, :], -jnp.inf), axis=1)
    return jnp.squeeze(pooled @ w3 + b3)


if __name__ == "__main__":
    # Small deterministic problem: 2 graphs of 8 nodes each (ring topology).
    n_features, n_actions, hidden = 4, 4, 16
    num_nodes, num_graphs = 16, 2

    key = jax.random.PRNGKey(0)
    k_x, k_ew, k_w1, k_w2, k_w3, k_b3 = jax.random.split(key, 6)

    # Node features
    x = jax.random.normal(k_x, (num_nodes, n_features), jnp.float32)

    # Edges: bidirectional ring inside each graph
    s0 = jnp.arange(8, dtype=jnp.int32)
    d0 = (s0 + 1) % 8
    row = jnp.concatenate([s0, d0, s0 + 8, d0 + 8])
    col = jnp.concatenate([d0, s0, d0 + 8, s0 + 8])
    edge_index = jnp.stack([row, col])                       # (2, 32)
    edge_weight = jax.random.uniform(k_ew, (edge_index.shape[1],),
                                     jnp.float32, 0.5, 1.5)  # (32,)
    batch = jnp.concatenate([jnp.zeros(8, jnp.int32), jnp.ones(8, jnp.int32)])

    # Parameters (GCNConv: glorot weight + zero bias; Linear: glorot + bias)
    w1 = glorot(k_w1, (n_features, hidden))
    b1 = jnp.zeros((1, hidden), jnp.float32)
    w2 = glorot(k_w2, (hidden, hidden))
    b2 = jnp.zeros((1, hidden), jnp.float32)
    w3 = glorot(k_w3, (hidden, n_actions))
    b3 = jax.random.uniform(k_b3, (1, n_actions), jnp.float32, -0.1, 0.1)

    out = gcn_policy_forward(x, edge_index, edge_weight, batch, num_graphs,
                             w1, b1, w2, b2, w3, b3)
    out = jax.block_until_ready(out)

    # f32 reference (kernel streams bf16 adjacency/activations/weights with f32
    # accumulation, so tolerance is loosened accordingly).
    adj_f32 = build_normalized_adjacency(edge_index, edge_weight, num_nodes)
    mask = build_graph_mask(batch, num_graphs)
    ref = jax_reference(adj_f32, x, mask, w1, b1, w2, b2, w3, b3)

    assert out.shape == (num_graphs, n_actions)
    assert bool(jnp.allclose(out, ref, atol=5e-2, rtol=5e-2)), "mismatch vs reference"

    print("KERNEL_OK")
</pallas_src>

<mosaic_0001>
module attributes {stable_mosaic.version = 11 : i64} {
  func.func @kernel(%arg0: i32, %arg1: i32, %arg2: memref<1xi32, #tpu.memory_space<smem>>, %arg3: memref<1xi32, #tpu.memory_space<smem>>, %arg4: memref<512x256xbf16, #tpu.memory_space<vmem>>, %arg5: memref<512x128xbf16, #tpu.memory_space<vmem>>, %arg6: memref<128x128xbf16, #tpu.memory_space<vmem>>, %arg7: memref<1x128xf32, #tpu.memory_space<vmem>>, %arg8: memref<512x128xbf16, #tpu.memory_space<vmem>>, %arg9: memref<512x128xf32, #tpu.memory_space<vmem>>) attributes {dimension_semantics = [#tpu.dimension_semantics<parallel>, #tpu.dimension_semantics<arbitrary>], iteration_bounds = array<i64: 1, 1>, scalar_prefetch = 2 : i64, scratch_operands = 1 : i64, tpu.core_type = #tpu.core_type<tc>, window_params = [{transform_indices = @transform_0, window_bounds = array<i64: 512, 256>}, {pipeline_mode = #tpu.pipeline_mode<synchronous>, transform_indices = @transform_1, window_bounds = array<i64: 512, 128>}, {pipeline_mode = #tpu.pipeline_mode<synchronous>, transform_indices = @transform_2, window_bounds = array<i64: 128, 128>}, {pipeline_mode = #tpu.pipeline_mode<synchronous>, transform_indices = @transform_3, window_bounds = array<i64: 1, 128>}, {transform_indices = @transform_4, window_bounds = array<i64: 512, 128>}]} {
    %c0_i32 = arith.constant 0 : i32
    %0 = arith.cmpi eq, %arg1, %c0_i32 : i32
    %1 = arith.extui %0 : i1 to i32
    %c0_i32_0 = arith.constant 0 : i32
    %2 = arith.cmpi ne, %1, %c0_i32_0 : i32
    scf.if %2 {
      %cst = arith.constant 0.000000e+00 : f32
      %14 = vector.broadcast %cst : f32 to vector<512x128xf32>
      %c0 = arith.constant 0 : index
      %c0_4 = arith.constant 0 : index
      %15 = vector.load %arg9[%c0, %c0_4] : memref<512x128xf32, #tpu.memory_space<vmem>>, vector<512x128xf32>
      tpu.vector_store %arg9[%c0, %c0_4], %14 {strides = array<i32>} : memref<512x128xf32, #tpu.memory_space<vmem>>, vector<512x128xf32>,
    } else {
    }
    %3 = arith.index_cast %arg0 : i32 to index
    %4 = memref.load %arg2[%3] : memref<1xi32, #tpu.memory_space<smem>>
    %5 = arith.addi %4, %arg1 : i32
    %6 = arith.index_cast %arg0 : i32 to index
    %7 = memref.load %arg3[%6] : memref<1xi32, #tpu.memory_space<smem>>
    %8 = arith.cmpi sle, %5, %7 : i32
    %9 = arith.extui %8 : i1 to i32
    %c0_i32_1 = arith.constant 0 : i32
    %10 = arith.cmpi ne, %9, %c0_i32_1 : i32
    scf.if %10 {
      %14 = arith.index_cast %arg0 : i32 to index
      %15 = memref.load %arg2[%14] : memref<1xi32, #tpu.memory_space<smem>>
      %16 = arith.addi %15, %arg1 : i32
      %c256_i32 = arith.constant 256 : i32
      %17 = arith.muli %16, %c256_i32 : i32
      %18 = tpu.assume_multiple %17, 256 : i32
      %19 = arith.index_cast %18 : i32 to index
      %c0 = arith.constant 0 : index
      %20 = vector.load %arg5[%19, %c0] : memref<512x128xbf16, #tpu.memory_space<vmem>>, vector<256x128xbf16>
      %c0_4 = arith.constant 0 : index
      %c0_5 = arith.constant 0 : index
      %21 = vector.load %arg9[%c0_4, %c0_5] : memref<512x128xf32, #tpu.memory_space<vmem>>, vector<512x128xf32>
      %c0_6 = arith.constant 0 : index
      %c0_7 = arith.constant 0 : index
      %22 = vector.load %arg4[%c0_6, %c0_7] : memref<512x256xbf16, #tpu.memory_space<vmem>>, vector<512x256xbf16>
      %cst = arith.constant dense<0.000000e+00> : vector<512x128xf32>
      %23 = tpu.matmul %22, %20, %cst {dimension_numbers = #tpu.dot_dimension_numbers<[1], [0], [0], [1], [0, 0, 1, 1], [], []>} : vector<512x256xbf16>, vector<256x128xbf16>, vector<512x128xf32> -> vector<512x128xf32>
      %24 = arith.addf %21, %23 : vector<512x128xf32>
      %c0_8 = arith.constant 0 : index
      %c0_9 = arith.constant 0 : index
      %25 = vector.load %arg9[%c0_8, %c0_9] : memref<512x128xf32, #tpu.memory_space<vmem>>, vector<512x128xf32>
      tpu.vector_store %arg9[%c0_8, %c0_9], %24 {strides = array<i32>} : memref<512x128xf32, #tpu.memory_space<vmem>>, vector<512x128xf32>,
    } else {
    }
    %c0_i32_2 = arith.constant 0 : i32
    %11 = arith.cmpi eq, %arg1, %c0_i32_2 : i32
    %12 = arith.extui %11 : i1 to i32
    %c0_i32_3 = arith.constant 0 : i32
    %13 = arith.cmpi ne, %12, %c0_i32_3 : i32
    scf.if %13 {
      %c0 = arith.constant 0 : index
      %c0_4 = arith.constant 0 : index
      %14 = vector.load %arg9[%c0, %c0_4] : memref<512x128xf32, #tpu.memory_space<vmem>>, vector<512x128xf32>
      %15 = arith.truncf %14 : vector<512x128xf32> to vector<512x128xbf16>
      %c0_5 = arith.constant 0 : index
      %c0_6 = arith.constant 0 : index
      %16 = vector.load %arg6[%c0_5, %c0_6] : memref<128x128xbf16, #tpu.memory_space<vmem>>, vector<128x128xbf16>
      %cst = arith.constant dense<0.000000e+00> : vector<512x128xf32>
      %17 = tpu.matmul %15, %16, %cst {dimension_numbers = #tpu.dot_dimension_numbers<[1], [0], [0], [1], [0, 0, 1, 1], [], []>} : vector<512x128xbf16>, vector<128x128xbf16>, vector<512x128xf32> -> vector<512x128xf32>
      %c0_7 = arith.constant 0 : index
      %c0_8 = arith.constant 0 : index
      %18 = vector.load %arg7[%c0_7, %c0_8] : memref<1x128xf32, #tpu.memory_space<vmem>>, vector<1x128xf32>
      %19 = vector.broadcast %18 : vector<1x128xf32> to vector<512x128xf32>
      %20 = arith.addf %17, %19 : vector<512x128xf32>
      %cst_9 = arith.constant 0.000000e+00 : f32
      %21 = vector.broadcast %cst_9 : f32 to vector<512x128xf32>
      %22 = arith.maximumf %20, %21 : vector<512x128xf32>
      %23 = arith.truncf %22 : vector<512x128xf32> to vector<512x128xbf16>
      %c0_10 = arith.constant 0 : index
      %c0_11 = arith.constant 0 : index
      %24 = vector.load %arg8[%c0_10, %c0_11] : memref<512x128xbf16, #tpu.memory_space<vmem>>, vector<512x128xbf16>
      tpu.vector_store %arg8[%c0_10, %c0_11], %23 {strides = array<i32>} : memref<512x128xbf16, #tpu.memory_space<vmem>>, vector<512x128xbf16>,
    } else {
    }
    return
  }
  func.func @transform_0(%arg0: i32, %arg1: i32, %arg2: memref<1xi32, #tpu.memory_space<smem>>, %arg3: memref<1xi32, #tpu.memory_space<smem>>) -> (i32, i32) {
    %0 = arith.index_cast %arg0 : i32 to index
    %1 = memref.load %arg2[%0] : memref<1xi32, #tpu.memory_space<smem>>
    %2 = arith.addi %1, %arg1 : i32
    %3 = arith.index_cast %arg0 : i32 to index
    %4 = memref.load %arg3[%3] : memref<1xi32, #tpu.memory_space<smem>>
    %5 = arith.minsi %2, %4 : i32
    %c0_i32 = arith.constant 0 : i32
    return %arg0, %5 : i32, i32
  }
  func.func @transform_1(%arg0: i32, %arg1: i32, %arg2: memref<1xi32, #tpu.memory_space<smem>>, %arg3: memref<1xi32, #tpu.memory_space<smem>>) -> (i32, i32) {
    %c0_i32 = arith.constant 0 : i32
    %c0_i32_0 = arith.constant 0 : i32
    %c0_i32_1 = arith.constant 0 : i32
    return %c0_i32, %c0_i32_0 : i32, i32
  }
  func.func @transform_2(%arg0: i32, %arg1: i32, %arg2: memref<1xi32, #tpu.memory_space<smem>>, %arg3: memref<1xi32, #tpu.memory_space<smem>>) -> (i32, i32) {
    %c0_i32 = arith.constant 0 : i32
    %c0_i32_0 = arith.constant 0 : i32
    %c0_i32_1 = arith.constant 0 : i32
    return %c0_i32, %c0_i32_0 : i32, i32
  }
  func.func @transform_3(%arg0: i32, %arg1: i32, %arg2: memref<1xi32, #tpu.memory_space<smem>>, %arg3: memref<1xi32, #tpu.memory_space<smem>>) -> (i32, i32) {
    %c0_i32 = arith.constant 0 : i32
    %c0_i32_0 = arith.constant 0 : i32
    %c0_i32_1 = arith.constant 0 : i32
    return %c0_i32, %c0_i32_0 : i32, i32
  }
  func.func @transform_4(%arg0: i32, %arg1: i32, %arg2: memref<1xi32, #tpu.memory_space<smem>>, %arg3: memref<1xi32, #tpu.memory_space<smem>>) -> (i32, i32) {
    %c0_i32 = arith.constant 0 : i32
    %c0_i32_0 = arith.constant 0 : i32
    return %arg0, %c0_i32 : i32, i32
  }
}

</mosaic_0001>

<bundles_post_ra>
// kernel: tpu_custom_call.1
= control target key start
LH: loop header
LB: loop body
LE: loop exit
PB: predicated region body
PF: predicated region fallthrough
CT: control target
= control target key end

     0   :  { %s3132_s0 = inlined_call_operand.<no memory space> [shape: s32[1], index: 0, kind: input, shape index: {}]   ;;  %s3133_s1 = inlined_call_operand.<no memory space> [shape: s32[1], index: 1, kind: input, shape index: {}]   ;;  %s3134_s2 = inlined_call_operand.hbm [shape: bf16[512,512], index: 2, kind: input, shape index: {}]   ;;  %s3135_s3 = inlined_call_operand.hbm [shape: bf16[512,128], index: 3, kind: input, shape index: {}]   ;;  %s3136_s4 = inlined_call_operand.hbm [shape: bf16[128,128], index: 4, kind: input, shape index: {}]   ;;  %s3137_s5 = inlined_call_operand.vmem [shape: f32[1,128], index: 5, kind: input, shape index: {}]   ;;  %s3138_s6 = inlined_call_operand.hbm [shape: bf16[512,128], index: 6, kind: output, shape index: {}]  }
   0x1   :  { %11 = sst [smem:[#allocation4]] %s3132_s0 }
   0x2   :  { %13 = vsyncpa [#allocation7], 0 }
   0x3   :  { %14 = vsyncpa [#allocation10], 0 }
   0x4   :  { %15 = vsyncpa [#allocation8], 0  ;;  %s2827_s23 = smov [#allocation9]   ;;  %s18_s25 = sld [smem:[#allocation4]] }
   0x5   :  { %s41_s24 = sshll.u32 %s2827_s23, 4  ;;  %s2731_s28 = scalar_lea.hbm %s3135_s3, 4096  ;;  %s42_s24 = int_to_ptr.vmem [resolvable:$true] %s41_s24 }
   0x6   :  { %p2732_p0 = scmp.ne.s32.totalorder %s3135_s3, %s2731_s28  ;;  %p2735_p1 = scmp.lt.u32.totalorder %s2731_s28, %s3135_s3 }
   0x8   :  { %p2737_p2 = pnand %p2735_p1, %p2732_p0 }
   0xa   :  { %2740 = shalt.err (!%p2737_p2)
}
   0xb   :  { %s2741_s0 = scalar_lea.vmem %s42_s24, 4096  ;;  %p2746_p4 = scmp.lt.s32.totalorder %s42_s24, %s42_s24 }
   0xc   :  { %p2742_p3 = scmp.ne.s32.totalorder %s42_s24, %s2741_s0  ;;  %p2747_p5 = scmp.lt.s32.totalorder %s2741_s0, %s2741_s0 }
   0xe   :  { %p2748_p6 = por %p2747_p5, %p2746_p4 }
  0x10   :  { %p2749_p7 = pnand %p2748_p6, %p2742_p3 }
  0x12   :  { %2752 = shalt.err (!%p2749_p7)
}
  0x13   :  { %s2828_s9 = smov 64   ;;  %s2829_s10 = smov 4  }
  0x14   :  { %47 = dma.hbm_to_vmem [thread:$0]  %s3135_s3, 4096, %s42_s24, [#allocation10], %s2828_s9, %s2828_s9, %s2829_s10  }
  0x15   :  { %s2830_s13 = smov [#allocation6]   ;;  %p21_p8 = scmp.lt.s32.totalorder %s18_s25, %s3133_s1 }
  0x16   :  { %s29_s14 = sshll.u32 %s2830_s13, 4  ;;  %s2831_s17 = smov [#allocation11]   ;;  %s2891_s14 = int_to_ptr.vmem [resolvable:$true] %s29_s14 }
  0x17   :  { %s53_s18 = sshll.u32 %s2831_s17, 4  ;;  %s3140_s25 = smov (!%p21_p8, %s18_s25), %s3133_s1  ;;  %s54_s18 = int_to_ptr.vmem [resolvable:$true] %s53_s18 }
  0x18   :  { %s2753_s23 = scalar_lea.hbm %s3136_s4, 1024 }
  0x19   :  { %p2754_p9 = scmp.ne.s32.totalorder %s3136_s4, %s2753_s23  ;;  %p2757_p10 = scmp.lt.u32.totalorder %s2753_s23, %s3136_s4 }
  0x1b   :  { %p2759_p11 = pnand %p2757_p10, %p2754_p9 }
  0x1d   :  { %2762 = shalt.err (!%p2759_p11)
}
  0x1e   :  { %s2763_s28 = scalar_lea.vmem %s54_s18, 1024  ;;  %p2768_p13 = scmp.lt.s32.totalorder %s54_s18, %s54_s18 }
  0x1f   :  { %p2764_p12 = scmp.ne.s32.totalorder %s54_s18, %s2763_s28  ;;  %p2769_p0 = scmp.lt.s32.totalorder %s2763_s28, %s2763_s28 }
  0x21   :  { %p2770_p1 = por %p2769_p0, %p2768_p13 }
  0x23   :  { %p2771_p2 = pnand %p2770_p1, %p2764_p12 }
  0x25   :  { %2774 = shalt.err (!%p2771_p2)
}
  0x26   :  { %59 = dma.hbm_to_vmem [thread:$0]  %s3136_s4, 1024, %s54_s18, [#allocation10], %s2828_s9, %s2828_s9, %s2829_s10  }
  0x27   :  { %s2176_s7 = sshll.u32 %s3140_s25, 7  ;;  %s2777_s16 = scalar_lea.hbm %s3134_s2, 16384 }
  0x28   :  { %s28_s11 = scalar_lea.hbm %s3134_s2, %s2176_s7 }
  0x29   :  { %s2775_s12 = scalar_lea.hbm %s28_s11, 8192  ;;  %p2778_p4 = scmp.lt.u32.totalorder %s28_s11, %s3134_s2 }
  0x2a   :  { %p2776_p3 = scmp.ne.s32.totalorder %s28_s11, %s2775_s12  ;;  %p2779_p5 = scmp.lt.u32.totalorder %s2777_s16, %s2775_s12 }
  0x2b   :  { %p2781_p7 = scmp.lt.u32.totalorder %s2775_s12, %s28_s11 }
  0x2c   :  { %p2780_p6 = por %p2779_p5, %p2778_p4 }
  0x2e   :  { %p2782_p8 = por %p2781_p7, %p2780_p6 }
  0x30   :  { %p2783_p9 = pnand %p2782_p8, %p2776_p3 }
  0x32   :  { %2786 = shalt.err (!%p2783_p9)
}
  0x33   :  { %s2787_s4 = scalar_lea.vmem %s2891_s14, 8192  ;;  %p2792_p11 = scmp.lt.s32.totalorder %s2891_s14, %s2891_s14 }
  0x34   :  { %p2788_p10 = scmp.ne.s32.totalorder %s2891_s14, %s2787_s4  ;;  %p2793_p12 = scmp.lt.s32.totalorder %s2787_s4, %s2787_s4 }
  0x36   :  { %p2794_p13 = por %p2793_p12, %p2792_p11 }
  0x38   :  { %p2795_p0 = pnand %p2794_p13, %p2788_p10 }
  0x3a   :  { %2798 = shalt.err (!%p2795_p0)
}
  0x3b   :  { %s2832_s25 = smov 256   ;;  %s2833_s2 = smov 128  }
  0x3c   :  { %s2834_s18 = smov 8  }
  0x3d   :  { %35 = dma.hbm_to_vmem [thread:$0]  %s28_s11, 8192, %s2891_s14, [#allocation7], %s2832_s25, %s2833_s2, %s2834_s18  }
  0x3e   :  { %2821 = dma.done.wait [#allocation7], 8192  }
  0x3f   :  { %2822 = vsyncadd [#allocation7], 4294959104 }
  0x40   :  { %2823 = dma.done.wait [#allocation10], 5120  }
  0x41   :  { %2824 = vsyncadd [#allocation10], 4294962176  ;;  %s2928_s20 = sld [smem:[#allocation4]]  ;;  %v2835_v0 = vmov 0.0  }
  0x42   :  { %82 = vst [vmem:[#allocation2] sm:$0xff] %v2835_v0  ;;  %83 = vst [vmem:[#allocation2 + $0x8] sm:$0xff] %v2835_v0 }
  0x43   :  { %84 = vst [vmem:[#allocation2 + $0x10] sm:$0xff] %v2835_v0  ;;  %85 = vst [vmem:[#allocation2 + $0x18] sm:$0xff] %v2835_v0 }
  0x44   :  { %86 = vst [vmem:[#allocation2 + $0x20] sm:$0xff] %v2835_v0  ;;  %87 = vst [vmem:[#allocation2 + $0x28] sm:$0xff] %v2835_v0 }
  0x45   :  { %88 = vst [vmem:[#allocation2 + $0x30] sm:$0xff] %v2835_v0  ;;  %89 = vst [vmem:[#allocation2 + $0x38] sm:$0xff] %v2835_v0 }
  0x46   :  { %90 = vst [vmem:[#allocation2 + $0x40] sm:$0xff] %v2835_v0  ;;  %91 = vst [vmem:[#allocation2 + $0x48] sm:$0xff] %v2835_v0 }
  0x47   :  { %92 = vst [vmem:[#allocation2 + $0x50] sm:$0xff] %v2835_v0  ;;  %93 = vst [vmem:[#allocation2 + $0x58] sm:$0xff] %v2835_v0  ;;  %p2020_p1 = scmp.gt.s32.totalorder %s2928_s20, %s3133_s1 }
  0x48   :  { %94 = vst [vmem:[#allocation2 + $0x60] sm:$0xff] %v2835_v0  ;;  %95 = vst [vmem:[#allocation2 + $0x68] sm:$0xff] %v2835_v0  ;;  %s153_s22 = sld [smem:[#allocation4]] (!%p2020_p1)  ;;  %v2836_v1 = vmov (!%p2020_p1), 0   ;;  %v2629_v2 = vld [vmem:[#allocation6 + $0x4] ss:$8 sps:$4 sm:$0xff] (!%p2020_p1)  }
  0x49   :  { %96 = vst [vmem:[#allocation2 + $0x70] sm:$0xff] %v2835_v0  ;;  %97 = vst [vmem:[#allocation2 + $0x78] sm:$0xff] %v2835_v0  ;;  %736 = vmatprep.subr.bf16.mxu0 (!%p2020_p1), %v2836_v1  ;;  %2552 = vmatprep.subr.bf16.mxu1 (!%p2020_p1), %v2836_v1  ;;  %v2632_v3 = vld [vmem:[#allocation6 + $0x104] ss:$8 sps:$4 sm:$0xff] (!%p2020_p1)   ;;  %v2627_v20 = vld [vmem:[#allocation6] ss:$8 sps:$4 sm:$0xff] (!%p2020_p1)  }
  0x4a   :  { %98 = vst [vmem:[#allocation2 + $0x80] sm:$0xff] %v2835_v0  ;;  %99 = vst [vmem:[#allocation2 + $0x88] sm:$0xff] %v2835_v0  ;;  %768 = vmatprep.mubr.bf16.mxu0 (!%p2020_p1), %v2629_v2  ;;  %896 = vmatprep.mubr.bf16.mxu1 (!%p2020_p1), %v2632_v3  ;;  %v2630_v21 = vld [vmem:[#allocation6 + $0x100] ss:$8 sps:$4 sm:$0xff] (!%p2020_p1)   ;;  %v2633_v22 = vld [vmem:[#allocation6 + $0x14] ss:$8 sps:$4 sm:$0xff] (!%p2020_p1)  }
  0x4b   :  { %100 = vst [vmem:[#allocation2 + $0x90] sm:$0xff] %v2835_v0  ;;  %101 = vst [vmem:[#allocation2 + $0x98] sm:$0xff] %v2835_v0  ;;  %v2635_v23 = vld [vmem:[#allocation6 + $0x114] ss:$8 sps:$4 sm:$0xff] (!%p2020_p1)   ;;  %v2637_v24 = vld [vmem:[#allocation6 + $0x10] ss:$8 sps:$4 sm:$0xff] (!%p2020_p1)  }
  0x4c   :  { %102 = vst [vmem:[#allocation2 + $0xa0] sm:$0xff] %v2835_v0  ;;  %103 = vst [vmem:[#allocation2 + $0xa8] sm:$0xff] %v2835_v0  ;;  %v2638_v25 = vld [vmem:[#allocation6 + $0x110] ss:$8 sps:$4 sm:$0xff] (!%p2020_p1)   ;;  %v2639_v26 = vld [vmem:[#allocation6 + $0x24] ss:$8 sps:$4 sm:$0xff] (!%p2020_p1)  }
  0x4d   :  { %104 = vst [vmem:[#allocation2 + $0xb0] sm:$0xff] %v2835_v0  ;;  %105 = vst [vmem:[#allocation2 + $0xb8] sm:$0xff] %v2835_v0  ;;  %v2641_v27 = vld [vmem:[#allocation6 + $0x124] ss:$8 sps:$4 sm:$0xff] (!%p2020_p1)   ;;  %v2643_v28 = vld [vmem:[#allocation6 + $0x20] ss:$8 sps:$4 sm:$0xff] (!%p2020_p1)  }
  0x4e   :  { %106 = vst [vmem:[#allocation2 + $0xc0] sm:$0xff] %v2835_v0  ;;  %107 = vst [vmem:[#allocation2 + $0xc8] sm:$0xff] %v2835_v0  ;;  %s2021_s23 = sshll.u32 (!%p2020_p1), %s153_s22, 8  ;;  %v2644_v29 = vld [vmem:[#allocation6 + $0x120] ss:$8 sps:$4 sm:$0xff] (!%p2020_p1)  }
  0x4f   :  { %108 = vst [vmem:[#allocation2 + $0xd0] sm:$0xff] %v2835_v0  ;;  %109 = vst [vmem:[#allocation2 + $0xd8] sm:$0xff] %v2835_v0  ;;  %s156_s3 = sshra.s32 (!%p2020_p1), %s2021_s23, 3  ;;  %v2645_v30 = vld [vmem:[#allocation6 + $0x34] ss:$8 sps:$4 sm:$0xff] (!%p2020_p1)  }
  0x50   :  { %110 = vst [vmem:[#allocation2 + $0xe0] sm:$0xff] %v2835_v0  ;;  %111 = vst [vmem:[#allocation2 + $0xe8] sm:$0xff] %v2835_v0  ;;  %s2022_s24 = sshll.u32 (!%p2020_p1), %s156_s3, 2  ;;  %v2647_v31 = vld [vmem:[#allocation6 + $0x134] ss:$8 sps:$4 sm:$0xff] (!%p2020_p1)  }
  0x51   :  { %112 = vst [vmem:[#allocation2 + $0xf0] sm:$0xff] %v2835_v0  ;;  %113 = vst [vmem:[#allocation2 + $0xf8] sm:$0xff] %v2835_v0  ;;  %s3000_s26 = scalar_lea.vmem (!%p2020_p1), [#allocation9], %s2022_s24  ;;  %v2649_v32 = vld [vmem:[#allocation6 + $0x30] ss:$8 sps:$4 sm:$0xff] (!%p2020_p1)  }
  0x52   :  { %114 = vst [vmem:[#allocation2 + $0x100] sm:$0xff] %v2835_v0  ;;  %115 = vst [vmem:[#allocation2 + $0x108] sm:$0xff] %v2835_v0  ;;  %v2611_v4 = vld [vmem:[%s3000_s26] sm:$0xff] (!%p2020_p1)   ;;  %v2612_v5 = vld [vmem:[%s3000_s26 + $0x8] sm:$0xff] (!%p2020_p1)  }
  0x53   :  { %116 = vst [vmem:[#allocation2 + $0x110] sm:$0xff] %v2835_v0  ;;  %117 = vst [vmem:[#allocation2 + $0x118] sm:$0xff] %v2835_v0  ;;  %737 = vmatpush1.bf16.msra.mxu0 (!%p2020_p1), %v2611_v4  ;;  %2568 = vmatpush1.bf16.msra.mxu1 (!%p2020_p1), %v2611_v4  ;;  %v2613_v6 = vld [vmem:[%s3000_s26 + $0x10] sm:$0xff] (!%p2020_p1)   ;;  %v2614_v7 = vld [vmem:[%s3000_s26 + $0x18] sm:$0xff] (!%p2020_p1)  }
  0x54   :  { %118 = vst [vmem:[#allocation2 + $0x120] sm:$0xff] %v2835_v0  ;;  %119 = vst [vmem:[#allocation2 + $0x128] sm:$0xff] %v2835_v0  ;;  %738 = vmatprep.subr.bf16.mxu0 (!%p2020_p1), %v2836_v1  ;;  %2553 = vmatprep.subr.bf16.mxu1 (!%p2020_p1), %v2836_v1  ;;  %v2615_v8 = vld [vmem:[%s3000_s26 + $0x20] sm:$0xff] (!%p2020_p1)   ;;  %v2616_v9 = vld [vmem:[%s3000_s26 + $0x28] sm:$0xff] (!%p2020_p1)  }
  0x55   :  { %120 = vst [vmem:[#allocation2 + $0x130] sm:$0xff] %v2835_v0  ;;  %121 = vst [vmem:[#allocation2 + $0x138] sm:$0xff] %v2835_v0  ;;  %v2617_v10 = vld [vmem:[%s3000_s26 + $0x30] sm:$0xff] (!%p2020_p1)   ;;  %v2618_v11 = vld [vmem:[%s3000_s26 + $0x38] sm:$0xff] (!%p2020_p1)  }
  0x56   :  { %122 = vst [vmem:[#allocation2 + $0x140] sm:$0xff] %v2835_v0  ;;  %123 = vst [vmem:[#allocation2 + $0x148] sm:$0xff] %v2835_v0  ;;  %v2619_v12 = vld [vmem:[%s3000_s26 + $0x40] sm:$0xff] (!%p2020_p1)   ;;  %v2620_v13 = vld [vmem:[%s3000_s26 + $0x48] sm:$0xff] (!%p2020_p1)  }
  0x57   :  { %124 = vst [vmem:[#allocation2 + $0x150] sm:$0xff] %v2835_v0  ;;  %125 = vst [vmem:[#allocation2 + $0x158] sm:$0xff] %v2835_v0  ;;  %739 = vmatpush1.bf16.msra.mxu0 (!%p2020_p1), %v2612_v5  ;;  %2569 = vmatpush1.bf16.msra.mxu1 (!%p2020_p1), %v2612_v5  ;;  %v2621_v14 = vld [vmem:[%s3000_s26 + $0x50] sm:$0xff] (!%p2020_p1)   ;;  %v2622_v15 = vld [vmem:[%s3000_s26 + $0x58] sm:$0xff] (!%p2020_p1)  }
  0x58   :  { %126 = vst [vmem:[#allocation2 + $0x160] sm:$0xff] %v2835_v0  ;;  %127 = vst [vmem:[#allocation2 + $0x168] sm:$0xff] %v2835_v0  ;;  %740 = vmatprep.subr.bf16.mxu0 (!%p2020_p1), %v2836_v1  ;;  %2554 = vmatprep.subr.bf16.mxu1 (!%p2020_p1), %v2836_v1  ;;  %v2623_v16 = vld [vmem:[%s3000_s26 + $0x60] sm:$0xff] (!%p2020_p1)   ;;  %v2624_v17 = vld [vmem:[%s3000_s26 + $0x68] sm:$0xff] (!%p2020_p1)  }
  0x59   :  { %128 = vst [vmem:[#allocation2 + $0x170] sm:$0xff] %v2835_v0  ;;  %129 = vst [vmem:[#allocation2 + $0x178] sm:$0xff] %v2835_v0  ;;  %v2625_v18 = vld [vmem:[%s3000_s26 + $0x70] sm:$0xff] (!%p2020_p1)   ;;  %v2626_v19 = vld [vmem:[%s3000_s26 + $0x78] sm:$0xff] (!%p2020_p1)  }
  0x5a   :  { %130 = vst [vmem:[#allocation2 + $0x180] sm:$0xff] %v2835_v0  ;;  %131 = vst [vmem:[#allocation2 + $0x188] sm:$0xff] %v2835_v0  ;;  %v2650_v33 = vld [vmem:[#allocation6 + $0x130] ss:$8 sps:$4 sm:$0xff] (!%p2020_p1)   ;;  %v2651_v34 = vld [vmem:[#allocation6 + $0x44] ss:$8 sps:$4 sm:$0xff] (!%p2020_p1)  }
  0x5b   :  { %132 = vst [vmem:[#allocation2 + $0x190] sm:$0xff] %v2835_v0  ;;  %133 = vst [vmem:[#allocation2 + $0x198] sm:$0xff] %v2835_v0  ;;  %152 = sbr.rel (%p2020_p1) target bundleno = 483 (0x1e3), region = 37  ;;  %741 = vmatpush1.bf16.msra.mxu0 (!%p2020_p1), %v2613_v6  ;;  %2570 = vmatpush1.bf16.msra.mxu1 (!%p2020_p1), %v2613_v6  ;;  %v2653_v35 = vld [vmem:[#allocation6 + $0x144] ss:$8 sps:$4 sm:$0xff] (!%p2020_p1)  }
  0x5c   :  { %134 = vst [vmem:[#allocation2 + $0x1a0] sm:$0xff] %v2835_v0  ;;  %135 = vst [vmem:[#allocation2 + $0x1a8] sm:$0xff] %v2835_v0  ;;  %742 = vmatprep.subr.bf16.mxu0 (!%p2020_p1), %v2836_v1  ;;  %2555 = vmatprep.subr.bf16.mxu1 (!%p2020_p1), %v2836_v1  ;;  %v2655_v36 = vld [vmem:[#allocation6 + $0x40] ss:$8 sps:$4 sm:$0xff] (!%p2020_p1)   ;;  %v2657_v38 = vld [vmem:[#allocation6 + $0x54] ss:$8 sps:$4 sm:$0xff] (!%p2020_p1)  }
  0x5d   :  { %136 = vst [vmem:[#allocation2 + $0x1b0] sm:$0xff] %v2835_v0  ;;  %137 = vst [vmem:[#allocation2 + $0x1b8] sm:$0xff] %v2835_v0  ;;  %v2656_v37 = vld [vmem:[#allocation6 + $0x140] ss:$8 sps:$4 sm:$0xff] (!%p2020_p1)   ;;  %v2659_v39 = vld [vmem:[#allocation6 + $0x154] ss:$8 sps:$4 sm:$0xff] (!%p2020_p1)  }
  0x5e   :  { %138 = vst [vmem:[#allocation2 + $0x1c0] sm:$0xff] %v2835_v0  ;;  %139 = vst [vmem:[#allocation2 + $0x1c8] sm:$0xff] %v2835_v0  ;;  %v2661_v40 = vld [vmem:[#allocation6 + $0x50] ss:$8 sps:$4 sm:$0xff] (!%p2020_p1)   ;;  %v2663_v42 = vld [vmem:[#allocation6 + $0x64] ss:$8 sps:$4 sm:$0xff] (!%p2020_p1)  }
  0x5f   :  { %140 = vst [vmem:[#allocation2 + $0x1d0] sm:$0xff] %v2835_v0  ;;  %141 = vst [vmem:[#allocation2 + $0x1d8] sm:$0xff] %v2835_v0  ;;  %743 = vmatpush1.bf16.msra.mxu0 (!%p2020_p1), %v2614_v7  ;;  %2571 = vmatpush1.bf16.msra.mxu1 (!%p2020_p1), %v2614_v7  ;;  %v2662_v41 = vld [vmem:[#allocation6 + $0x150] ss:$8 sps:$4 sm:$0xff] (!%p2020_p1)   ;;  %v2665_v43 = vld [vmem:[#allocation6 + $0x164] ss:$8 sps:$4 sm:$0xff] (!%p2020_p1)  }
  0x60   :  { %142 = vst [vmem:[#allocation2 + $0x1e0] sm:$0xff] %v2835_v0  ;;  %143 = vst [vmem:[#allocation2 + $0x1e8] sm:$0xff] %v2835_v0  ;;  %744 = vmatprep.subr.bf16.mxu0 (!%p2020_p1), %v2836_v1  ;;  %2556 = vmatprep.subr.bf16.mxu1 (!%p2020_p1), %v2836_v1  ;;  %v2667_v44 = vld [vmem:[#allocation6 + $0x60] ss:$8 sps:$4 sm:$0xff] (!%p2020_p1)   ;;  %v2669_v46 = vld [vmem:[#allocation6 + $0x74] ss:$8 sps:$4 sm:$0xff] (!%p2020_p1)  }
  0x61   :  { %144 = vst [vmem:[#allocation2 + $0x1f0] sm:$0xff] %v2835_v0  ;;  %145 = vst [vmem:[#allocation2 + $0x1f8] sm:$0xff] %v2835_v0  ;;  %v2668_v45 = vld [vmem:[#allocation6 + $0x160] ss:$8 sps:$4 sm:$0xff] (!%p2020_p1)   ;;  %v2671_v47 = vld [vmem:[#allocation6 + $0x174] ss:$8 sps:$4 sm:$0xff] (!%p2020_p1)  }
  0x62   :  { %v2673_v48 = vld [vmem:[#allocation6 + $0x70] ss:$8 sps:$4 sm:$0xff]   ;;  %v2675_v50 = vld [vmem:[#allocation6 + $0x84] ss:$8 sps:$4 sm:$0xff]   ;;  %v2679_v52 = vld [vmem:[#allocation6 + $0x80] ss:$8 sps:$4 sm:$0xff]  }
  0x63   :  { %745 = vmatpush1.bf16.msra.mxu0 %v2615_v8  ;;  %2572 = vmatpush1.bf16.msra.mxu1 %v2615_v8  ;;  %v2674_v49 = vld [vmem:[#allocation6 + $0x170] ss:$8 sps:$4 sm:$0xff]   ;;  %v2677_v51 = vld [vmem:[#allocation6 + $0x184] ss:$8 sps:$4 sm:$0xff]   ;;  %v2680_v53 = vld [vmem:[#allocation6 + $0x180] ss:$8 sps:$4 sm:$0xff]  }
  0x64   :  { %746 = vmatprep.subr.bf16.mxu0 %v2836_v1  ;;  %2557 = vmatprep.subr.bf16.mxu1 %v2836_v1  ;;  %v2681_v54 = vld [vmem:[#allocation6 + $0x94] ss:$8 sps:$4 sm:$0xff]   ;;  %v2685_v56 = vld [vmem:[#allocation6 + $0x90] ss:$8 sps:$4 sm:$0xff]   ;;  %v2687_v58 = vld [vmem:[#allocation6 + $0xa4] ss:$8 sps:$4 sm:$0xff]  }
  0x65   :  { %v2683_v55 = vld [vmem:[#allocation6 + $0x194] ss:$8 sps:$4 sm:$0xff]   ;;  %v2686_v57 = vld [vmem:[#allocation6 + $0x190] ss:$8 sps:$4 sm:$0xff]   ;;  %v2689_v59 = vld [vmem:[#allocation6 + $0x1a4] ss:$8 sps:$4 sm:$0xff]  }
  0x66   :  { %v2691_v60 = vld [vmem:[#allocation6 + $0xa0] ss:$8 sps:$4 sm:$0xff]   ;;  %v2693_v62 = vld [vmem:[#allocation6 + $0xb4] ss:$8 sps:$4 sm:$0xff]   ;;  %v2697_v0 = vld [vmem:[#allocation6 + $0xb0] ss:$8 sps:$4 sm:$0xff]  }
  0x67   :  { %747 = vmatpush1.bf16.msra.mxu0 %v2616_v9  ;;  %2573 = vmatpush1.bf16.msra.mxu1 %v2616_v9  ;;  %v2692_v61 = vld [vmem:[#allocation6 + $0x1a0] ss:$8 sps:$4 sm:$0xff]   ;;  %v2695_v63 = vld [vmem:[#allocation6 + $0x1b4] ss:$8 sps:$4 sm:$0xff]   ;;  %v2699_v2 = vld [vmem:[#allocation6 + $0xc4] ss:$8 sps:$4 sm:$0xff]  }
  0x68   :  { %748 = vmatprep.subr.bf16.mxu0 %v2836_v1  ;;  %2558 = vmatprep.subr.bf16.mxu1 %v2836_v1  ;;  %v2701_v3 = vld [vmem:[#allocation6 + $0x1c4] ss:$8 sps:$4 sm:$0xff]   ;;  %v2703_v4 = vld [vmem:[#allocation6 + $0xc0] ss:$8 sps:$4 sm:$0xff]   ;;  %v2705_v6 = vld [vmem:[#allocation6 + $0xd4] ss:$8 sps:$4 sm:$0xff]  }
  0x69   :  { %v2704_v5 = vld [vmem:[#allocation6 + $0x1c0] ss:$8 sps:$4 sm:$0xff]   ;;  %v2707_v7 = vld [vmem:[#allocation6 + $0x1d4] ss:$8 sps:$4 sm:$0xff]   ;;  %v2709_v8 = vld [vmem:[#allocation6 + $0xd0] ss:$8 sps:$4 sm:$0xff]  }
  0x6a   :  { %v2710_v9 = vld [vmem:[#allocation6 + $0x1d0] ss:$8 sps:$4 sm:$0xff]  }
  0x6b   :  { %749 = vmatpush1.bf16.msra.mxu0 %v2617_v10  ;;  %2574 = vmatpush1.bf16.msra.mxu1 %v2617_v10  ;;  %v2711_v10 = vld [vmem:[#allocation6 + $0xe4] ss:$8 sps:$4 sm:$0xff]  }
  0x6c   :  { %750 = vmatprep.subr.bf16.mxu0 %v2836_v1  ;;  %2559 = vmatprep.subr.bf16.mxu1 %v2836_v1 }
  0x6f   :  { %751 = vmatpush1.bf16.msra.mxu0 %v2618_v11  ;;  %2575 = vmatpush1.bf16.msra.mxu1 %v2618_v11  ;;  %v2713_v11 = vld [vmem:[#allocation6 + $0x1e4] ss:$8 sps:$4 sm:$0xff]  }
  0x70   :  { %752 = vmatprep.subr.bf16.mxu0 %v2836_v1  ;;  %2560 = vmatprep.subr.bf16.mxu1 %v2836_v1 }
  0x73   :  { %753 = vmatpush1.bf16.msra.mxu0 %v2619_v12  ;;  %2576 = vmatpush1.bf16.msra.mxu1 %v2619_v12  ;;  %v2715_v12 = vld [vmem:[#allocation6 + $0xe0] ss:$8 sps:$4 sm:$0xff]  }
  0x74   :  { %754 = vmatprep.subr.bf16.mxu0 %v2836_v1  ;;  %2561 = vmatprep.subr.bf16.mxu1 %v2836_v1 }
  0x77   :  { %755 = vmatpush1.bf16.msra.mxu0 %v2620_v13  ;;  %2577 = vmatpush1.bf16.msra.mxu1 %v2620_v13  ;;  %v2716_v13 = vld [vmem:[#allocation6 + $0x1e0] ss:$8 sps:$4 sm:$0xff]  }
  0x78   :  { %756 = vmatprep.subr.bf16.mxu0 %v2836_v1  ;;  %2562 = vmatprep.subr.bf16.mxu1 %v2836_v1 }
  0x7b   :  { %757 = vmatpush1.bf16.msra.mxu0 %v2621_v14  ;;  %2578 = vmatpush1.bf16.msra.mxu1 %v2621_v14  ;;  %v2717_v14 = vld [vmem:[#allocation6 + $0xf4] ss:$8 sps:$4 sm:$0xff]  }
  0x7c   :  { %758 = vmatprep.subr.bf16.mxu0 %v2836_v1  ;;  %2563 = vmatprep.subr.bf16.mxu1 %v2836_v1 }
  0x7f   :  { %759 = vmatpush1.bf16.msra.mxu0 %v2622_v15  ;;  %2579 = vmatpush1.bf16.msra.mxu1 %v2622_v15  ;;  %v2719_v15 = vld [vmem:[#allocation6 + $0x1f4] ss:$8 sps:$4 sm:$0xff]  }
  0x80   :  { %760 = vmatprep.subr.bf16.mxu0 %v2836_v1  ;;  %2564 = vmatprep.subr.bf16.mxu1 %v2836_v1 }
  0x83   :  { %761 = vmatpush1.bf16.msra.mxu0 %v2623_v16  ;;  %2580 = vmatpush1.bf16.msra.mxu1 %v2623_v16  ;;  %v2721_v16 = vld [vmem:[#allocation6 + $0xf0] ss:$8 sps:$4 sm:$0xff]  }
  0x84   :  { %762 = vmatprep.subr.bf16.mxu0 %v2836_v1  ;;  %2565 = vmatprep.subr.bf16.mxu1 %v2836_v1 }
  0x87   :  { %763 = vmatpush1.bf16.msra.mxu0 %v2624_v17  ;;  %2581 = vmatpush1.bf16.msra.mxu1 %v2624_v17  ;;  %v2722_v17 = vld [vmem:[#allocation6 + $0x1f0] ss:$8 sps:$4 sm:$0xff]  }
  0x88   :  { %764 = vmatprep.subr.bf16.mxu0 %v2836_v1  ;;  %2566 = vmatprep.subr.bf16.mxu1 %v2836_v1 }
  0x8b   :  { %765 = vmatpush1.bf16.msra.mxu0 %v2625_v18  ;;  %2582 = vmatpush1.bf16.msra.mxu1 %v2625_v18  ;;  %v192_v18 = vld [vmem:[#allocation2] sm:$0xff] }
  0x8c   :  { %766 = vmatprep.subr.bf16.mxu0 %v2836_v1  ;;  %2567 = vmatprep.subr.bf16.mxu1 %v2836_v1  ;;  %v2698_v1 = vld [vmem:[#allocation6 + $0x1b0] ss:$8 sps:$4 sm:$0xff]  }
  0x8f   :  { %767 = vmatpush1.bf16.msra.mxu0 %v2626_v19  ;;  %2583 = vmatpush1.bf16.msra.mxu1 %v2626_v19  ;;  %v224_v19 = vld [vmem:[#allocation2 + $0x100] sm:$0xff] }
  0x92   :  { %769 = vmatmul.mubr.bf16.vlgmr.msra.gmra.mrb[0].mxu0 %v2627_v20  ;;  %897 = vmatmul.mubr.bf16.vlgmr.msra.gmra.mrb[0].mxu1 %v2630_v21 }
  0x93   :  { %776 = vmatprep.mubr.bf16.mxu0 %v2633_v22  ;;  %904 = vmatprep.mubr.bf16.mxu1 %v2635_v23  ;;  %v193_v22 = vld [vmem:[#allocation2 + $0x8] sm:$0xff] }
  0x94   :  { %v225_v23 = vld [vmem:[#allocation2 + $0x108] sm:$0xff] }
  0x9a   :  { %777 = vmatmul.mubr.bf16.gmra.mrb[4].mxu0 %v2637_v24  ;;  %905 = vmatmul.mubr.bf16.gmra.mrb[4].mxu1 %v2638_v25 }
  0x9b   :  { %784 = vmatprep.mubr.bf16.mxu0 %v2639_v26  ;;  %912 = vmatprep.mubr.bf16.mxu1 %v2641_v27 }
  0xa2   :  { %785 = vmatmul.mubr.bf16.gmra.mrb[8].mxu0 %v2643_v28  ;;  %913 = vmatmul.mubr.bf16.gmra.mrb[8].mxu1 %v2644_v29 }
  0xa3   :  { %792 = vmatprep.mubr.bf16.mxu0 %v2645_v30  ;;  %920 = vmatprep.mubr.bf16.mxu1 %v2647_v31 }
  0xaa   :  { %793 = vmatmul.mubr.bf16.gmra.mrb[12].mxu0 %v2649_v32  ;;  %921 = vmatmul.mubr.bf16.gmra.mrb[12].mxu1 %v2650_v33 }
  0xab   :  { %800 = vmatprep.mubr.bf16.mxu0 %v2651_v34  ;;  %928 = vmatprep.mubr.bf16.mxu1 %v2653_v35  ;;  %v194_v34 = vld [vmem:[#allocation2 + $0x10] sm:$0xff] }
  0xac   :  { %v226_v35 = vld [vmem:[#allocation2 + $0x110] sm:$0xff] }
  0xb2   :  { %801 = vmatmul.mubr.bf16.gmra.mrb[16].mxu0 %v2655_v36  ;;  %929 = vmatmul.mubr.bf16.gmra.mrb[16].mxu1 %v2656_v37 }
  0xb3   :  { %808 = vmatprep.mubr.bf16.mxu0 %v2657_v38  ;;  %936 = vmatprep.mubr.bf16.mxu1 %v2659_v39  ;;  %v195_v38 = vld [vmem:[#allocation2 + $0x18] sm:$0xff] }
  0xb4   :  { %v227_v39 = vld [vmem:[#allocation2 + $0x118] sm:$0xff] }
  0xba   :  { %809 = vmatmul.mubr.bf16.gmra.mrb[20].mxu0 %v2661_v40  ;;  %937 = vmatmul.mubr.bf16.gmra.mrb[20].mxu1 %v2662_v41 }
  0xbb   :  { %816 = vmatprep.mubr.bf16.mxu0 %v2663_v42  ;;  %944 = vmatprep.mubr.bf16.mxu1 %v2665_v43 }
  0xc2   :  { %817 = vmatmul.mubr.bf16.gmra.mrb[24].mxu0 %v2667_v44  ;;  %945 = vmatmul.mubr.bf16.gmra.mrb[24].mxu1 %v2668_v45 }
  0xc3   :  { %824 = vmatprep.mubr.bf16.mxu0 %v2669_v46  ;;  %952 = vmatprep.mubr.bf16.mxu1 %v2671_v47 }
  0xca   :  { %825 = vmatmul.mubr.bf16.gmra.mrb[28].mxu0 %v2673_v48  ;;  %953 = vmatmul.mubr.bf16.gmra.mrb[28].mxu1 %v2674_v49 }
  0xcb   :  { %832 = vmatprep.mubr.bf16.mxu0 %v2675_v50  ;;  %960 = vmatprep.mubr.bf16.mxu1 %v2677_v51  ;;  %v196_v50 = vld [vmem:[#allocation2 + $0x20] sm:$0xff] }
  0xcc   :  { %v228_v51 = vld [vmem:[#allocation2 + $0x120] sm:$0xff] }
  0xd2   :  { %833 = vmatmul.mubr.bf16.gmra.mrb[32].mxu0 %v2679_v52  ;;  %961 = vmatmul.mubr.bf16.gmra.mrb[32].mxu1 %v2680_v53 }
  0xd3   :  { %840 = vmatprep.mubr.bf16.mxu0 %v2681_v54  ;;  %968 = vmatprep.mubr.bf16.mxu1 %v2683_v55  ;;  %v197_v54 = vld [vmem:[#allocation2 + $0x28] sm:$0xff] }
  0xd4   :  { %v229_v55 = vld [vmem:[#allocation2 + $0x128] sm:$0xff] }
  0xda   :  { %841 = vmatmul.mubr.bf16.gmra.mrb[36].mxu0 %v2685_v56  ;;  %969 = vmatmul.mubr.bf16.gmra.mrb[36].mxu1 %v2686_v57 }
  0xdb   :  { %848 = vmatprep.mubr.bf16.mxu0 %v2687_v58  ;;  %976 = vmatprep.mubr.bf16.mxu1 %v2689_v59 }
  0xe2   :  { %849 = vmatmul.mubr.bf16.gmra.mrb[40].mxu0 %v2691_v60  ;;  %977 = vmatmul.mubr.bf16.gmra.mrb[40].mxu1 %v2692_v61 }
  0xe3   :  { %856 = vmatprep.mubr.bf16.mxu0 %v2693_v62  ;;  %984 = vmatprep.mubr.bf16.mxu1 %v2695_v63 }
  0xea   :  { %857 = vmatmul.mubr.bf16.gmra.mrb[44].mxu0 %v2697_v0  ;;  %985 = vmatmul.mubr.bf16.gmra.mrb[44].mxu1 %v2698_v1 }
  0xeb   :  { %864 = vmatprep.mubr.bf16.mxu0 %v2699_v2  ;;  %992 = vmatprep.mubr.bf16.mxu1 %v2701_v3  ;;  %v198_v2 = vld [vmem:[#allocation2 + $0x30] sm:$0xff] }
  0xec   :  { %v230_v3 = vld [vmem:[#allocation2 + $0x130] sm:$0xff] }
  0xf2   :  { %865 = vmatmul.mubr.bf16.gmra.mrb[48].mxu0 %v2703_v4  ;;  %993 = vmatmul.mubr.bf16.gmra.mrb[48].mxu1 %v2704_v5 }
  0xf3   :  { %872 = vmatprep.mubr.bf16.mxu0 %v2705_v6  ;;  %1000 = vmatprep.mubr.bf16.mxu1 %v2707_v7  ;;  %v199_v6 = vld [vmem:[#allocation2 + $0x38] sm:$0xff] }
  0xf4   :  { %v231_v7 = vld [vmem:[#allocation2 + $0x138] sm:$0xff] }
  0xfa   :  { %873 = vmatmul.mubr.bf16.gmra.mrb[52].mxu0 %v2709_v8  ;;  %1001 = vmatmul.mubr.bf16.gmra.mrb[52].mxu1 %v2710_v9 }
  0xfb   :  { %880 = vmatprep.mubr.bf16.mxu0 %v2711_v10  ;;  %1008 = vmatprep.mubr.bf16.mxu1 %v2713_v11 }
 0x102   :  { %881 = vmatmul.mubr.bf16.gmra.mrb[56].mxu0 %v2715_v12  ;;  %1009 = vmatmul.mubr.bf16.gmra.mrb[56].mxu1 %v2716_v13 }
 0x103   :  { %888 = vmatprep.mubr.bf16.mxu0 %v2717_v14  ;;  %1016 = vmatprep.mubr.bf16.mxu1 %v2719_v15 }
 0x10a   :  { %889 = vmatmul.mubr.bf16.gmra.mrb[60].mxu0 %v2721_v16  ;;  %1017 = vmatmul.mubr.bf16.gmra.mrb[60].mxu1 %v2722_v17 }
 0x165   :  { %v770_v20 = vpop.f32.mrb[0].mxu0  ;;  %v898_v21 = vpop.f32.mrb[0].mxu1 }
 0x166   :  { %v1025_v24 = vadd.f32 %v770_v20, %v192_v18  ;;  %v1057_v25 = vadd.f32 %v898_v21, %v224_v19  ;;  %v772_v26 = vpop.f32.mrb[1].mxu0  ;;  %v900_v27 = vpop.f32.mrb[1].mxu1  ;;  %v200_v18 = vld [vmem:[#allocation2 + $0x40] sm:$0xff] }
 0x167   :  { %v773_v28 = vpop.f32.mrb[2].mxu0  ;;  %v901_v29 = vpop.f32.mrb[2].mxu1  ;;  %v232_v19 = vld [vmem:[#allocation2 + $0x140] sm:$0xff] }
 0x168   :  { %1089 = vst [vmem:[#allocation2] sm:$0xff] %v1025_v24  ;;  %1121 = vst [vmem:[#allocation2 + $0x100] sm:$0xff] %v1057_v25  ;;  %v1026_v30 = vadd.f32 %v773_v28, %v193_v22  ;;  %v1058_v31 = vadd.f32 %v901_v29, %v225_v23  ;;  %v775_v32 = vpop.f32.mrb[3].mxu0  ;;  %v903_v33 = vpop.f32.mrb[3].mxu1  ;;  %v201_v22 = vld [vmem:[#allocation2 + $0x48] sm:$0xff] }
 0x169   :  { %v233_v23 = vld [vmem:[#allocation2 + $0x148] sm:$0xff] }
 0x16a   :  { %1090 = vst [vmem:[#allocation2 + $0x8] sm:$0xff] %v1026_v30  ;;  %1122 = vst [vmem:[#allocation2 + $0x108] sm:$0xff] %v1058_v31 }
 0x16d   :  { %v778_v36 = vpop.f32.mrb[4].mxu0  ;;  %v906_v37 = vpop.f32.mrb[4].mxu1 }
 0x16e   :  { %v1027_v40 = vadd.f32 %v778_v36, %v194_v34  ;;  %v1059_v41 = vadd.f32 %v906_v37, %v226_v35  ;;  %v780_v42 = vpop.f32.mrb[5].mxu0  ;;  %v908_v43 = vpop.f32.mrb[5].mxu1  ;;  %v202_v34 = vld [vmem:[#allocation2 + $0x50] sm:$0xff] }
 0x16f   :  { %v781_v44 = vpop.f32.mrb[6].mxu0  ;;  %v909_v45 = vpop.f32.mrb[6].mxu1  ;;  %v234_v35 = vld [vmem:[#allocation2 + $0x150] sm:$0xff] }
 0x170   :  { %1091 = vst [vmem:[#allocation2 + $0x10] sm:$0xff] %v1027_v40  ;;  %1123 = vst [vmem:[#allocation2 + $0x110] sm:$0xff] %v1059_v41  ;;  %v1028_v46 = vadd.f32 %v781_v44, %v195_v38  ;;  %v1060_v47 = vadd.f32 %v909_v45, %v227_v39  ;;  %v783_v48 = vpop.f32.mrb[7].mxu0  ;;  %v911_v49 = vpop.f32.mrb[7].mxu1  ;;  %v203_v38 = vld [vmem:[#allocation2 + $0x58] sm:$0xff] }
 0x171   :  { %v235_v39 = vld [vmem:[#allocation2 + $0x158] sm:$0xff] }
 0x172   :  { %1092 = vst [vmem:[#allocation2 + $0x18] sm:$0xff] %v1028_v46  ;;  %1124 = vst [vmem:[#allocation2 + $0x118] sm:$0xff] %v1060_v47 }
 0x175   :  { %v786_v52 = vpop.f32.mrb[8].mxu0  ;;  %v914_v53 = vpop.f32.mrb[8].mxu1 }
 0x176   :  { %v1029_v56 = vadd.f32 %v786_v52, %v196_v50  ;;  %v1061_v57 = vadd.f32 %v914_v53, %v228_v51  ;;  %v788_v58 = vpop.f32.mrb[9].mxu0  ;;  %v916_v59 = vpop.f32.mrb[9].mxu1  ;;  %v204_v50 = vld [vmem:[#allocation2 + $0x60] sm:$0xff] }
 0x177   :  { %v789_v60 = vpop.f32.mrb[10].mxu0  ;;  %v917_v61 = vpop.f32.mrb[10].mxu1  ;;  %v236_v51 = vld [vmem:[#allocation2 + $0x160] sm:$0xff] }
 0x178   :  { %1093 = vst [vmem:[#allocation2 + $0x20] sm:$0xff] %v1029_v56  ;;  %1125 = vst [vmem:[#allocation2 + $0x120] sm:$0xff] %v1061_v57  ;;  %v1030_v62 = vadd.f32 %v789_v60, %v197_v54  ;;  %v1062_v63 = vadd.f32 %v917_v61, %v229_v55  ;;  %v791_v0 = vpop.f32.mrb[11].mxu0  ;;  %v919_v1 = vpop.f32.mrb[11].mxu1  ;;  %v205_v54 = vld [vmem:[#allocation2 + $0x68] sm:$0xff] }
 0x179   :  { %v237_v55 = vld [vmem:[#allocation2 + $0x168] sm:$0xff] }
 0x17a   :  { %1094 = vst [vmem:[#allocation2 + $0x28] sm:$0xff] %v1030_v62  ;;  %1126 = vst [vmem:[#allocation2 + $0x128] sm:$0xff] %v1062_v63 }
 0x17d   :  { %v794_v4 = vpop.f32.mrb[12].mxu0  ;;  %v922_v5 = vpop.f32.mrb[12].mxu1 }
 0x17e   :  { %v1031_v8 = vadd.f32 %v794_v4, %v198_v2  ;;  %v1063_v9 = vadd.f32 %v922_v5, %v230_v3  ;;  %v796_v10 = vpop.f32.mrb[13].mxu0  ;;  %v924_v11 = vpop.f32.mrb[13].mxu1  ;;  %v206_v2 = vld [vmem:[#allocation2 + $0x70] sm:$0xff] }
 0x17f   :  { %v797_v12 = vpop.f32.mrb[14].mxu0  ;;  %v925_v13 = vpop.f32.mrb[14].mxu1  ;;  %v238_v3 = vld [vmem:[#allocation2 + $0x170] sm:$0xff] }
 0x180   :  { %1095 = vst [vmem:[#allocation2 + $0x30] sm:$0xff] %v1031_v8  ;;  %1127 = vst [vmem:[#allocation2 + $0x130] sm:$0xff] %v1063_v9  ;;  %v1032_v14 = vadd.f32 %v797_v12, %v199_v6  ;;  %v1064_v15 = vadd.f32 %v925_v13, %v231_v7  ;;  %v799_v16 = vpop.f32.mrb[15].mxu0  ;;  %v927_v17 = vpop.f32.mrb[15].mxu1  ;;  %v207_v6 = vld [vmem:[#allocation2 + $0x78] sm:$0xff] }
 0x181   :  { %v239_v7 = vld [vmem:[#allocation2 + $0x178] sm:$0xff] }
 0x182   :  { %1096 = vst [vmem:[#allocation2 + $0x38] sm:$0xff] %v1032_v14  ;;  %1128 = vst [vmem:[#allocation2 + $0x138] sm:$0xff] %v1064_v15 }
 0x185   :  { %v802_v20 = vpop.f32.mrb[16].mxu0  ;;  %v930_v21 = vpop.f32.mrb[16].mxu1 }
 0x186   :  { %v1033_v24 = vadd.f32 %v802_v20, %v200_v18  ;;  %v1065_v25 = vadd.f32 %v930_v21, %v232_v19  ;;  %v804_v26 = vpop.f32.mrb[17].mxu0  ;;  %v932_v27 = vpop.f32.mrb[17].mxu1  ;;  %v208_v18 = vld [vmem:[#allocation2 + $0x80] sm:$0xff] }
 0x187   :  { %v805_v28 = vpop.f32.mrb[18].mxu0  ;;  %v933_v29 = vpop.f32.mrb[18].mxu1  ;;  %v240_v19 = vld [vmem:[#allocation2 + $0x180] sm:$0xff] }
 0x188   :  { %1097 = vst [vmem:[#allocation2 + $0x40] sm:$0xff] %v1033_v24  ;;  %1129 = vst [vmem:[#allocation2 + $0x140] sm:$0xff] %v1065_v25  ;;  %v1034_v30 = vadd.f32 %v805_v28, %v201_v22  ;;  %v1066_v31 = vadd.f32 %v933_v29, %v233_v23  ;;  %v807_v32 = vpop.f32.mrb[19].mxu0  ;;  %v935_v33 = vpop.f32.mrb[19].mxu1  ;;  %v209_v22 = vld [vmem:[#allocation2 + $0x88] sm:$0xff] }
 0x189   :  { %v241_v23 = vld [vmem:[#allocation2 + $0x188] sm:$0xff] }
 0x18a   :  { %1098 = vst [vmem:[#allocation2 + $0x48] sm:$0xff] %v1034_v30  ;;  %1130 = vst [vmem:[#allocation2 + $0x148] sm:$0xff] %v1066_v31 }
 0x18d   :  { %v810_v36 = vpop.f32.mrb[20].mxu0  ;;  %v938_v37 = vpop.f32.mrb[20].mxu1 }
 0x18e   :  { %v1035_v40 = vadd.f32 %v810_v36, %v202_v34  ;;  %v1067_v41 = vadd.f32 %v938_v37, %v234_v35  ;;  %v812_v42 = vpop.f32.mrb[21].mxu0  ;;  %v940_v43 = vpop.f32.mrb[21].mxu1  ;;  %v210_v34 = vld [vmem:[#allocation2 + $0x90] sm:$0xff] }
 0x18f   :  { %v813_v44 = vpop.f32.mrb[22].mxu0  ;;  %v941_v45 = vpop.f32.mrb[22].mxu1  ;;  %v242_v35 = vld [vmem:[#allocation2 + $0x190] sm:$0xff] }
 0x190   :  { %1099 = vst [vmem:[#allocation2 + $0x50] sm:$0xff] %v1035_v40  ;;  %1131 = vst [vmem:[#allocation2 + $0x150] sm:$0xff] %v1067_v41  ;;  %v1036_v46 = vadd.f32 %v813_v44, %v203_v38  ;;  %v1068_v47 = vadd.f32 %v941_v45, %v235_v39  ;;  %v815_v48 = vpop.f32.mrb[23].mxu0  ;;  %v943_v49 = vpop.f32.mrb[23].mxu1  ;;  %v211_v38 = vld [vmem:[#allocation2 + $0x98] sm:$0xff] }
 0x191   :  { %v243_v39 = vld [vmem:[#allocation2 + $0x198] sm:$0xff] }
 0x192   :  { %1100 = vst [vmem:[#allocation2 + $0x58] sm:$0xff] %v1036_v46  ;;  %1132 = vst [vmem:[#allocation2 + $0x158] sm:$0xff] %v1068_v47 }
 0x195   :  { %v818_v52 = vpop.f32.mrb[24].mxu0  ;;  %v946_v53 = vpop.f32.mrb[24].mxu1 }
 0x196   :  { %v1037_v56 = vadd.f32 %v818_v52, %v204_v50  ;;  %v1069_v57 = vadd.f32 %v946_v53, %v236_v51  ;;  %v820_v58 = vpop.f32.mrb[25].mxu0  ;;  %v948_v59 = vpop.f32.mrb[25].mxu1  ;;  %v212_v50 = vld [vmem:[#allocation2 + $0xa0] sm:$0xff] }
 0x197   :  { %v821_v60 = vpop.f32.mrb[26].mxu0  ;;  %v949_v61 = vpop.f32.mrb[26].mxu1  ;;  %v244_v51 = vld [vmem:[#allocation2 + $0x1a0] sm:$0xff] }
 0x198   :  { %1101 = vst [vmem:[#allocation2 + $0x60] sm:$0xff] %v1037_v56  ;;  %1133 = vst [vmem:[#allocation2 + $0x160] sm:$0xff] %v1069_v57  ;;  %v1038_v62 = vadd.f32 %v821_v60, %v205_v54  ;;  %v1070_v63 = vadd.f32 %v949_v61, %v237_v55  ;;  %v823_v0 = vpop.f32.mrb[27].mxu0  ;;  %v951_v1 = vpop.f32.mrb[27].mxu1  ;;  %v213_v54 = vld [vmem:[#allocation2 + $0xa8] sm:$0xff] }
 0x199   :  { %v245_v55 = vld [vmem:[#allocation2 + $0x1a8] sm:$0xff] }
 0x19a   :  { %1102 = vst [vmem:[#allocation2 + $0x68] sm:$0xff] %v1038_v62  ;;  %1134 = vst [vmem:[#allocation2 + $0x168] sm:$0xff] %v1070_v63 }
 0x19d   :  { %v826_v4 = vpop.f32.mrb[28].mxu0  ;;  %v954_v5 = vpop.f32.mrb[28].mxu1 }
 0x19e   :  { %v1039_v8 = vadd.f32 %v826_v4, %v206_v2  ;;  %v1071_v9 = vadd.f32 %v954_v5, %v238_v3  ;;  %v828_v10 = vpop.f32.mrb[29].mxu0  ;;  %v956_v11 = vpop.f32.mrb[29].mxu1  ;;  %v214_v2 = vld [vmem:[#allocation2 + $0xb0] sm:$0xff] }
 0x19f   :  { %v829_v12 = vpop.f32.mrb[30].mxu0  ;;  %v957_v13 = vpop.f32.mrb[30].mxu1  ;;  %v246_v3 = vld [vmem:[#allocation2 + $0x1b0] sm:$0xff] }
 0x1a0   :  { %1103 = vst [vmem:[#allocation2 + $0x70] sm:$0xff] %v1039_v8  ;;  %1135 = vst [vmem:[#allocation2 + $0x170] sm:$0xff] %v1071_v9  ;;  %v1040_v14 = vadd.f32 %v829_v12, %v207_v6  ;;  %v1072_v15 = vadd.f32 %v957_v13, %v239_v7  ;;  %v831_v16 = vpop.f32.mrb[31].mxu0  ;;  %v959_v17 = vpop.f32.mrb[31].mxu1  ;;  %v215_v6 = vld [vmem:[#allocation2 + $0xb8] sm:$0xff] }
 0x1a1   :  { %v247_v7 = vld [vmem:[#allocation2 + $0x1b8] sm:$0xff] }
 0x1a2   :  { %1104 = vst [vmem:[#allocation2 + $0x78] sm:$0xff] %v1040_v14  ;;  %1136 = vst [vmem:[#allocation2 + $0x178] sm:$0xff] %v1072_v15 }
 0x1a5   :  { %v834_v20 = vpop.f32.mrb[32].mxu0  ;;  %v962_v21 = vpop.f32.mrb[32].mxu1 }
 0x1a6   :  { %v1041_v24 = vadd.f32 %v834_v20, %v208_v18  ;;  %v1073_v25 = vadd.f32 %v962_v21, %v240_v19  ;;  %v836_v26 = vpop.f32.mrb[33].mxu0  ;;  %v964_v27 = vpop.f32.mrb[33].mxu1  ;;  %v216_v18 = vld [vmem:[#allocation2 + $0xc0] sm:$0xff] }
 0x1a7   :  { %v837_v28 = vpop.f32.mrb[34].mxu0  ;;  %v965_v29 = vpop.f32.mrb[34].mxu1  ;;  %v248_v19 = vld [vmem:[#allocation2 + $0x1c0] sm:$0xff] }
 0x1a8   :  { %1105 = vst [vmem:[#allocation2 + $0x80] sm:$0xff] %v1041_v24  ;;  %1137 = vst [vmem:[#allocation2 + $0x180] sm:$0xff] %v1073_v25  ;;  %v1042_v30 = vadd.f32 %v837_v28, %v209_v22  ;;  %v1074_v31 = vadd.f32 %v965_v29, %v241_v23  ;;  %v839_v32 = vpop.f32.mrb[35].mxu0  ;;  %v967_v33 = vpop.f32.mrb[35].mxu1  ;;  %v217_v22 = vld [vmem:[#allocation2 + $0xc8] sm:$0xff] }
 0x1a9   :  { %v249_v23 = vld [vmem:[#allocation2 + $0x1c8] sm:$0xff] }
 0x1aa   :  { %1106 = vst [vmem:[#allocation2 + $0x88] sm:$0xff] %v1042_v30  ;;  %1138 = vst [vmem:[#allocation2 + $0x188] sm:$0xff] %v1074_v31 }
 0x1ad   :  { %v842_v36 = vpop.f32.mrb[36].mxu0  ;;  %v970_v37 = vpop.f32.mrb[36].mxu1 }
 0x1ae   :  { %v1043_v40 = vadd.f32 %v842_v36, %v210_v34  ;;  %v1075_v41 = vadd.f32 %v970_v37, %v242_v35  ;;  %v844_v42 = vpop.f32.mrb[37].mxu0  ;;  %v972_v43 = vpop.f32.mrb[37].mxu1  ;;  %v218_v34 = vld [vmem:[#allocation2 + $0xd0] sm:$0xff] }
 0x1af   :  { %v845_v44 = vpop.f32.mrb[38].mxu0  ;;  %v973_v45 = vpop.f32.mrb[38].mxu1  ;;  %v250_v35 = vld [vmem:[#allocation2 + $0x1d0] sm:$0xff] }
 0x1b0   :  { %1107 = vst [vmem:[#allocation2 + $0x90] sm:$0xff] %v1043_v40  ;;  %1139 = vst [vmem:[#allocation2 + $0x190] sm:$0xff] %v1075_v41  ;;  %v1044_v46 = vadd.f32 %v845_v44, %v211_v38  ;;  %v1076_v47 = vadd.f32 %v973_v45, %v243_v39  ;;  %v847_v48 = vpop.f32.mrb[39].mxu0  ;;  %v975_v49 = vpop.f32.mrb[39].mxu1  ;;  %v219_v38 = vld [vmem:[#allocation2 + $0xd8] sm:$0xff] }
 0x1b1   :  { %v251_v39 = vld [vmem:[#allocation2 + $0x1d8] sm:$0xff] }
 0x1b2   :  { %1108 = vst [vmem:[#allocation2 + $0x98] sm:$0xff] %v1044_v46  ;;  %1140 = vst [vmem:[#allocation2 + $0x198] sm:$0xff] %v1076_v47 }
 0x1b5   :  { %v850_v52 = vpop.f32.mrb[40].mxu0  ;;  %v978_v53 = vpop.f32.mrb[40].mxu1 }
 0x1b6   :  { %v1045_v56 = vadd.f32 %v850_v52, %v212_v50  ;;  %v1077_v57 = vadd.f32 %v978_v53, %v244_v51  ;;  %v852_v58 = vpop.f32.mrb[41].mxu0  ;;  %v980_v59 = vpop.f32.mrb[41].mxu1  ;;  %v220_v50 = vld [vmem:[#allocation2 + $0xe0] sm:$0xff] }
 0x1b7   :  { %v853_v60 = vpop.f32.mrb[42].mxu0  ;;  %v981_v61 = vpop.f32.mrb[42].mxu1  ;;  %v252_v51 = vld [vmem:[#allocation2 + $0x1e0] sm:$0xff] }
 0x1b8   :  { %1109 = vst [vmem:[#allocation2 + $0xa0] sm:$0xff] %v1045_v56  ;;  %1141 = vst [vmem:[#allocation2 + $0x1a0] sm:$0xff] %v1077_v57  ;;  %v1046_v62 = vadd.f32 %v853_v60, %v213_v54  ;;  %v1078_v63 = vadd.f32 %v981_v61, %v245_v55  ;;  %v855_v0 = vpop.f32.mrb[43].mxu0  ;;  %v983_v1 = vpop.f32.mrb[43].mxu1  ;;  %v221_v54 = vld [vmem:[#allocation2 + $0xe8] sm:$0xff] }
 0x1b9   :  { %v253_v55 = vld [vmem:[#allocation2 + $0x1e8] sm:$0xff] }
 0x1ba   :  { %1110 = vst [vmem:[#allocation2 + $0xa8] sm:$0xff] %v1046_v62  ;;  %1142 = vst [vmem:[#allocation2 + $0x1a8] sm:$0xff] %v1078_v63 }
 0x1bd   :  { %v858_v4 = vpop.f32.mrb[44].mxu0  ;;  %v986_v5 = vpop.f32.mrb[44].mxu1 }
 0x1be   :  { %v1047_v8 = vadd.f32 %v858_v4, %v214_v2  ;;  %v1079_v9 = vadd.f32 %v986_v5, %v246_v3  ;;  %v860_v10 = vpop.f32.mrb[45].mxu0  ;;  %v988_v11 = vpop.f32.mrb[45].mxu1  ;;  %v222_v2 = vld [vmem:[#allocation2 + $0xf0] sm:$0xff] }
 0x1bf   :  { %v861_v12 = vpop.f32.mrb[46].mxu0  ;;  %v989_v13 = vpop.f32.mrb[46].mxu1  ;;  %v254_v3 = vld [vmem:[#allocation2 + $0x1f0] sm:$0xff] }
 0x1c0   :  { %1111 = vst [vmem:[#allocation2 + $0xb0] sm:$0xff] %v1047_v8  ;;  %1143 = vst [vmem:[#allocation2 + $0x1b0] sm:$0xff] %v1079_v9  ;;  %v1048_v14 = vadd.f32 %v861_v12, %v215_v6  ;;  %v1080_v15 = vadd.f32 %v989_v13, %v247_v7  ;;  %v863_v16 = vpop.f32.mrb[47].mxu0  ;;  %v991_v17 = vpop.f32.mrb[47].mxu1  ;;  %v223_v6 = vld [vmem:[#allocation2 + $0xf8] sm:$0xff] }
 0x1c1   :  { %v255_v7 = vld [vmem:[#allocation2 + $0x1f8] sm:$0xff] }
 0x1c2   :  { %1112 = vst [vmem:[#allocation2 + $0xb8] sm:$0xff] %v1048_v14  ;;  %1144 = vst [vmem:[#allocation2 + $0x1b8] sm:$0xff] %v1080_v15 }
 0x1c5   :  { %v866_v20 = vpop.f32.mrb[48].mxu0  ;;  %v994_v21 = vpop.f32.mrb[48].mxu1 }
 0x1c6   :  { %v1049_v24 = vadd.f32 %v866_v20, %v216_v18  ;;  %v1081_v25 = vadd.f32 %v994_v21, %v248_v19  ;;  %v868_v26 = vpop.f32.mrb[49].mxu0  ;;  %v996_v27 = vpop.f32.mrb[49].mxu1 }
 0x1c7   :  { %v869_v28 = vpop.f32.mrb[50].mxu0  ;;  %v997_v29 = vpop.f32.mrb[50].mxu1 }
 0x1c8   :  { %1113 = vst [vmem:[#allocation2 + $0xc0] sm:$0xff] %v1049_v24  ;;  %1145 = vst [vmem:[#allocation2 + $0x1c0] sm:$0xff] %v1081_v25  ;;  %v1050_v30 = vadd.f32 %v869_v28, %v217_v22  ;;  %v1082_v31 = vadd.f32 %v997_v29, %v249_v23  ;;  %v871_v32 = vpop.f32.mrb[51].mxu0  ;;  %v999_v33 = vpop.f32.mrb[51].mxu1 }
 0x1ca   :  { %1114 = vst [vmem:[#allocation2 + $0xc8] sm:$0xff] %v1050_v30  ;;  %1146 = vst [vmem:[#allocation2 + $0x1c8] sm:$0xff] %v1082_v31 }
 0x1cd   :  { %v874_v36 = vpop.f32.mrb[52].mxu0  ;;  %v1002_v37 = vpop.f32.mrb[52].mxu1 }
 0x1ce   :  { %v1051_v40 = vadd.f32 %v874_v36, %v218_v34  ;;  %v1083_v41 = vadd.f32 %v1002_v37, %v250_v35  ;;  %v876_v42 = vpop.f32.mrb[53].mxu0  ;;  %v1004_v43 = vpop.f32.mrb[53].mxu1 }
 0x1cf   :  { %v877_v44 = vpop.f32.mrb[54].mxu0  ;;  %v1005_v45 = vpop.f32.mrb[54].mxu1 }
 0x1d0   :  { %1115 = vst [vmem:[#allocation2 + $0xd0] sm:$0xff] %v1051_v40  ;;  %1147 = vst [vmem:[#allocation2 + $0x1d0] sm:$0xff] %v1083_v41  ;;  %v1052_v46 = vadd.f32 %v877_v44, %v219_v38  ;;  %v1084_v47 = vadd.f32 %v1005_v45, %v251_v39  ;;  %v879_v48 = vpop.f32.mrb[55].mxu0  ;;  %v1007_v49 = vpop.f32.mrb[55].mxu1 }
 0x1d2   :  { %1116 = vst [vmem:[#allocation2 + $0xd8] sm:$0xff] %v1052_v46  ;;  %1148 = vst [vmem:[#allocation2 + $0x1d8] sm:$0xff] %v1084_v47 }
 0x1d5   :  { %v882_v52 = vpop.f32.mrb[56].mxu0  ;;  %v1010_v53 = vpop.f32.mrb[56].mxu1 }
 0x1d6   :  { %v1053_v56 = vadd.f32 %v882_v52, %v220_v50  ;;  %v1085_v57 = vadd.f32 %v1010_v53, %v252_v51  ;;  %v884_v58 = vpop.f32.mrb[57].mxu0  ;;  %v1012_v59 = vpop.f32.mrb[57].mxu1 }
 0x1d7   :  { %v885_v60 = vpop.f32.mrb[58].mxu0  ;;  %v1013_v61 = vpop.f32.mrb[58].mxu1 }
 0x1d8   :  { %1117 = vst [vmem:[#allocation2 + $0xe0] sm:$0xff] %v1053_v56  ;;  %1149 = vst [vmem:[#allocation2 + $0x1e0] sm:$0xff] %v1085_v57  ;;  %v1054_v62 = vadd.f32 %v885_v60, %v221_v54  ;;  %v1086_v63 = vadd.f32 %v1013_v61, %v253_v55  ;;  %v887_v0 = vpop.f32.mrb[59].mxu0  ;;  %v1015_v1 = vpop.f32.mrb[59].mxu1 }
 0x1da   :  { %1118 = vst [vmem:[#allocation2 + $0xe8] sm:$0xff] %v1054_v62  ;;  %1150 = vst [vmem:[#allocation2 + $0x1e8] sm:$0xff] %v1086_v63 }
 0x1dd   :  { %v890_v4 = vpop.f32.mrb[60].mxu0  ;;  %v1018_v5 = vpop.f32.mrb[60].mxu1 }
 0x1de   :  { %v1055_v8 = vadd.f32 %v890_v4, %v222_v2  ;;  %v1087_v9 = vadd.f32 %v1018_v5, %v254_v3  ;;  %v892_v10 = vpop.f32.mrb[61].mxu0  ;;  %v1020_v11 = vpop.f32.mrb[61].mxu1 }
 0x1df   :  { %v893_v12 = vpop.f32.mrb[62].mxu0  ;;  %v1021_v13 = vpop.f32.mrb[62].mxu1 }
 0x1e0   :  { %1119 = vst [vmem:[#allocation2 + $0xf0] sm:$0xff] %v1055_v8  ;;  %1151 = vst [vmem:[#allocation2 + $0x1f0] sm:$0xff] %v1087_v9  ;;  %v1056_v14 = vadd.f32 %v893_v12, %v223_v6  ;;  %v1088_v15 = vadd.f32 %v1021_v13, %v255_v7  ;;  %v895_v16 = vpop.f32.mrb[63].mxu0  ;;  %v1023_v17 = vpop.f32.mrb[63].mxu1 }
 0x1e2   :  { %1120 = vst [vmem:[#allocation2 + $0xf8] sm:$0xff] %v1056_v14  ;;  %1152 = vst [vmem:[#allocation2 + $0x1f8] sm:$0xff] %v1088_v15 }
 0x1e3 PF:  { %v2723_v18 = vld [vmem:[#allocation11] sm:$0xff]   ;;  %v2724_v19 = vld [vmem:[#allocation11 + $0x8] sm:$0xff]   ;;  %v2725_v20 = vld [vmem:[#allocation11 + $0x10] sm:$0xff]  }
 0x1e4   :  { %2472 = vmatprep.subr.bf16.mxu0 %v2723_v18  ;;  %2584 = vmatprep.subr.bf16.mxu1 %v2723_v18  ;;  %v2726_v21 = vld [vmem:[#allocation11 + $0x18] sm:$0xff]   ;;  %v1156_v22 = vld [vmem:[#allocation2] sm:$0xff]  ;;  %v1157_v23 = vld [vmem:[#allocation2 + $0x8] sm:$0xff] }
 0x1e5   :  { %2473 = vmatpush3.bf16.msra.mxu0 %v2723_v18  ;;  %2592 = vmatpush3.bf16.msra.mxu1 %v2723_v18  ;;  %v1188_v24 = vld [vmem:[#allocation2 + $0x100] sm:$0xff]  ;;  %v1220_v25 = vpack.c.bf16 %v1157_v23, %v1156_v22  ;;  %v1189_v26 = vld [vmem:[#allocation2 + $0x108] sm:$0xff]  ;;  %v2729_v30 = vld [vmem:[#allocation11 + $0x30] sm:$0xff]  }
 0x1e6   :  { %2474 = vmatprep.subr.bf16.mxu0 %v2724_v19  ;;  %2585 = vmatprep.subr.bf16.mxu1 %v2724_v19  ;;  %v1236_v27 = vpack.c.bf16 %v1189_v26, %v1188_v24  ;;  %v2727_v28 = vld [vmem:[#allocation11 + $0x20] sm:$0xff]   ;;  %v2728_v29 = vld [vmem:[#allocation11 + $0x28] sm:$0xff]   ;;  %v2730_v31 = vld [vmem:[#allocation11 + $0x38] sm:$0xff]  }
 0x1e7   :  { %2488 = vmatprep.mubr.bf16.mxu0 %v1220_v25  ;;  %v1158_v32 = vld [vmem:[#allocation2 + $0x10] sm:$0xff]  ;;  %v1159_v33 = vld [vmem:[#allocation2 + $0x18] sm:$0xff]  ;;  %v1160_v36 = vld [vmem:[#allocation2 + $0x20] sm:$0xff] }
 0x1e8   :  { %2520 = vmatprep.mubr.bf16.mxu1 %v1236_v27  ;;  %v1190_v34 = vld [vmem:[#allocation2 + $0x110] sm:$0xff]  ;;  %v1191_v35 = vld [vmem:[#allocation2 + $0x118] sm:$0xff]  ;;  %v1161_v37 = vld [vmem:[#allocation2 + $0x28] sm:$0xff]  ;;  %v1221_v40 = vpack.c.bf16 %v1159_v33, %v1158_v32 }
 0x1e9   :  { %2475 = vmatpush3.bf16.msra.mxu0 %v2724_v19  ;;  %2593 = vmatpush3.bf16.msra.mxu1 %v2724_v19  ;;  %v1192_v38 = vld [vmem:[#allocation2 + $0x120] sm:$0xff]  ;;  %v1193_v39 = vld [vmem:[#allocation2 + $0x128] sm:$0xff]  ;;  %v1237_v41 = vpack.c.bf16 %v1191_v35, %v1190_v34  ;;  %v1222_v42 = vpack.c.bf16 %v1161_v37, %v1160_v36  ;;  %v1162_v44 = vld [vmem:[#allocation2 + $0x30] sm:$0xff] }
 0x1ea   :  { %2476 = vmatprep.subr.bf16.mxu0 %v2725_v20  ;;  %2586 = vmatprep.subr.bf16.mxu1 %v2725_v20  ;;  %v1238_v43 = vpack.c.bf16 %v1193_v39, %v1192_v38  ;;  %v1163_v45 = vld [vmem:[#allocation2 + $0x38] sm:$0xff]  ;;  %v1194_v46 = vld [vmem:[#allocation2 + $0x130] sm:$0xff]  ;;  %v1164_v48 = vld [vmem:[#allocation2 + $0x40] sm:$0xff] }
 0x1eb   :  { %v1195_v47 = vld [vmem:[#allocation2 + $0x138] sm:$0xff]  ;;  %v1165_v49 = vld [vmem:[#allocation2 + $0x48] sm:$0xff]  ;;  %v1196_v50 = vld [vmem:[#allocation2 + $0x140] sm:$0xff]  ;;  %v1223_v52 = vpack.c.bf16 %v1163_v45, %v1162_v44 }
 0x1ec   :  { %v1197_v51 = vld [vmem:[#allocation2 + $0x148] sm:$0xff]  ;;  %v1239_v53 = vpack.c.bf16 %v1195_v47, %v1194_v46  ;;  %v1224_v54 = vpack.c.bf16 %v1165_v49, %v1164_v48  ;;  %v1166_v56 = vld [vmem:[#allocation2 + $0x50] sm:$0xff]  ;;  %v1167_v57 = vld [vmem:[#allocation2 + $0x58] sm:$0xff] }
 0x1ed   :  { %2477 = vmatpush3.bf16.msra.mxu0 %v2725_v20  ;;  %2594 = vmatpush3.bf16.msra.mxu1 %v2725_v20  ;;  %v1240_v55 = vpack.c.bf16 %v1197_v51, %v1196_v50  ;;  %v1198_v58 = vld [vmem:[#allocation2 + $0x150] sm:$0xff]  ;;  %v1199_v59 = vld [vmem:[#allocation2 + $0x158] sm:$0xff]  ;;  %v1168_v60 = vld [vmem:[#allocation2 + $0x60] sm:$0xff]  ;;  %v1225_v0 = vpack.c.bf16 %v1167_v57, %v1166_v56 }
 0x1ee   :  { %2478 = vmatprep.subr.bf16.mxu0 %v2726_v21  ;;  %2587 = vmatprep.subr.bf16.mxu1 %v2726_v21  ;;  %v1169_v61 = vld [vmem:[#allocation2 + $0x68] sm:$0xff]  ;;  %v1200_v62 = vld [vmem:[#allocation2 + $0x160] sm:$0xff]  ;;  %v1241_v1 = vpack.c.bf16 %v1199_v59, %v1198_v58  ;;  %v1170_v4 = vld [vmem:[#allocation2 + $0x70] sm:$0xff] }
 0x1ef   :  { %v1201_v63 = vld [vmem:[#allocation2 + $0x168] sm:$0xff]  ;;  %v1226_v2 = vpack.c.bf16 %v1169_v61, %v1168_v60  ;;  %v1171_v5 = vld [vmem:[#allocation2 + $0x78] sm:$0xff]  ;;  %v1202_v6 = vld [vmem:[#allocation2 + $0x170] sm:$0xff] }
 0x1f0   :  { %v1242_v3 = vpack.c.bf16 %v1201_v63, %v1200_v62  ;;  %v1203_v7 = vld [vmem:[#allocation2 + $0x178] sm:$0xff]  ;;  %v1172_v8 = vld [vmem:[#allocation2 + $0x80] sm:$0xff]  ;;  %v1173_v9 = vld [vmem:[#allocation2 + $0x88] sm:$0xff]  ;;  %v1227_v12 = vpack.c.bf16 %v1171_v5, %v1170_v4 }
 0x1f1   :  { %2479 = vmatpush3.bf16.msra.mxu0 %v2726_v21  ;;  %2595 = vmatpush3.bf16.msra.mxu1 %v2726_v21  ;;  %v1204_v10 = vld [vmem:[#allocation2 + $0x180] sm:$0xff]  ;;  %v1205_v11 = vld [vmem:[#allocation2 + $0x188] sm:$0xff]  ;;  %v1243_v13 = vpack.c.bf16 %v1203_v7, %v1202_v6  ;;  %v1228_v14 = vpack.c.bf16 %v1173_v9, %v1172_v8  ;;  %v1174_v16 = vld [vmem:[#allocation2 + $0x90] sm:$0xff] }
 0x1f2   :  { %2480 = vmatprep.subr.bf16.mxu0 %v2727_v28  ;;  %2588 = vmatprep.subr.bf16.mxu1 %v2727_v28  ;;  %v1244_v15 = vpack.c.bf16 %v1205_v11, %v1204_v10  ;;  %v1175_v17 = vld [vmem:[#allocation2 + $0x98] sm:$0xff]  ;;  %v1206_v18 = vld [vmem:[#allocation2 + $0x190] sm:$0xff]  ;;  %v1176_v20 = vld [vmem:[#allocation2 + $0xa0] sm:$0xff] }
 0x1f3   :  { %v1207_v19 = vld [vmem:[#allocation2 + $0x198] sm:$0xff]  ;;  %v1177_v21 = vld [vmem:[#allocation2 + $0xa8] sm:$0xff]  ;;  %v1208_v22 = vld [vmem:[#allocation2 + $0x1a0] sm:$0xff]  ;;  %v1229_v24 = vpack.c.bf16 %v1175_v17, %v1174_v16 }
 0x1f4   :  { %v1209_v23 = vld [vmem:[#allocation2 + $0x1a8] sm:$0xff]  ;;  %v1245_v25 = vpack.c.bf16 %v1207_v19, %v1206_v18  ;;  %v1230_v26 = vpack.c.bf16 %v1177_v21, %v1176_v20  ;;  %v1180_v32 = vld [vmem:[#allocation2 + $0xc0] sm:$0xff] }
 0x1f5   :  { %2481 = vmatpush3.bf16.msra.mxu0 %v2727_v28  ;;  %2596 = vmatpush3.bf16.msra.mxu1 %v2727_v28  ;;  %v1246_v27 = vpack.c.bf16 %v1209_v23, %v1208_v22  ;;  %v1178_v28 = vld [vmem:[#allocation2 + $0xb0] sm:$0xff]  ;;  %v1181_v33 = vld [vmem:[#allocation2 + $0xc8] sm:$0xff]  ;;  %v1212_v34 = vld [vmem:[#allocation2 + $0x1c0] sm:$0xff] }
 0x1f6   :  { %2482 = vmatprep.subr.bf16.mxu0 %v2728_v29  ;;  %2589 = vmatprep.subr.bf16.mxu1 %v2728_v29  ;;  %v1213_v35 = vld [vmem:[#allocation2 + $0x1c8] sm:$0xff]  ;;  %v1232_v38 = vpack.c.bf16 %v1181_v33, %v1180_v32  ;;  %v1184_v44 = vld [vmem:[#allocation2 + $0xe0] sm:$0xff] }
 0x1f7   :  { %v1248_v39 = vpack.c.bf16 %v1213_v35, %v1212_v34  ;;  %v1185_v45 = vld [vmem:[#allocation2 + $0xe8] sm:$0xff]  ;;  %v1216_v46 = vld [vmem:[#allocation2 + $0x1e0] sm:$0xff] }
 0x1f8   :  { %v1217_v47 = vld [vmem:[#allocation2 + $0x1e8] sm:$0xff]  ;;  %v1234_v50 = vpack.c.bf16 %v1185_v45, %v1184_v44  ;;  %v3051_v58 = vld [vmem:[%s3137_s5] ss:$0 sm:$0xff]  ;;  %s2837_s5 = smov [#allocation12]  }
 0x1f9   :  { %2483 = vmatpush3.bf16.msra.mxu0 %v2728_v29  ;;  %2597 = vmatpush3.bf16.msra.mxu1 %v2728_v29  ;;  %v1179_v29 = vld [vmem:[#allocation2 + $0xb8] sm:$0xff]  ;;  %v1250_v51 = vpack.c.bf16 %v1217_v47, %v1216_v46  ;;  %s2001_s28 = sshll.u32 %s2837_s5, 4  ;;  %s2002_s28 = int_to_ptr.vmem [resolvable:$true] %s2001_s28 }
 0x1fa   :  { %2484 = vmatprep.subr.bf16.mxu0 %v2729_v30  ;;  %2590 = vmatprep.subr.bf16.mxu1 %v2729_v30  ;;  %v1231_v36 = vpack.c.bf16 %v1179_v29, %v1178_v28  ;;  %s2799_s29 = scalar_lea.vmem %s2002_s28, 4096  ;;  %p2804_p3 = scmp.lt.s32.totalorder %s2002_s28, %s2002_s28 }
 0x1fb   :  { %p2800_p2 = scmp.ne.s32.totalorder %s2002_s28, %s2799_s29  ;;  %p2805_p4 = scmp.lt.s32.totalorder %s2799_s29, %s2799_s29 }
 0x1fd   :  { %2485 = vmatpush3.bf16.msra.mxu0 %v2729_v30  ;;  %2598 = vmatpush3.bf16.msra.mxu1 %v2729_v30  ;;  %v1210_v30 = vld [vmem:[#allocation2 + $0x1b0] sm:$0xff]  ;;  %p2806_p5 = por %p2805_p4, %p2804_p3 }
 0x1fe   :  { %2486 = vmatprep.subr.bf16.mxu0 %v2730_v31  ;;  %2591 = vmatprep.subr.bf16.mxu1 %v2730_v31 }
 0x1ff   :  { %p2807_p6 = pnand %p2806_p5, %p2800_p2 }
 0x201   :  { %2487 = vmatpush3.bf16.msra.mxu0 %v2730_v31  ;;  %2599 = vmatpush3.bf16.msra.mxu1 %v2730_v31  ;;  %v1211_v31 = vld [vmem:[#allocation2 + $0x1b8] sm:$0xff] }
 0x202   :  { %v1247_v37 = vpack.c.bf16 %v1211_v31, %v1210_v30 }
 0x204   :  { %2489 = vmatmul.mubr.bf16.vlgmr.msra.gmra.mrb[0].mxu0 %v1221_v40  ;;  %2521 = vmatmul.mubr.bf16.vlgmr.msra.gmra.mrb[0].mxu1 %v1237_v41  ;;  %v1182_v40 = vld [vmem:[#allocation2 + $0xd0] sm:$0xff]  ;;  %v1183_v41 = vld [vmem:[#allocation2 + $0xd8] sm:$0xff] }
 0x205   :  { %2492 = vmatprep.mubr.bf16.mxu0 %v1222_v42  ;;  %2524 = vmatprep.mubr.bf16.mxu1 %v1238_v43  ;;  %v1214_v42 = vld [vmem:[#allocation2 + $0x1d0] sm:$0xff]  ;;  %v1215_v43 = vld [vmem:[#allocation2 + $0x1d8] sm:$0xff]  ;;  %v1233_v48 = vpack.c.bf16 %v1183_v41, %v1182_v40 }
 0x206   :  { %v1249_v49 = vpack.c.bf16 %v1215_v43, %v1214_v42 }
 0x20c   :  { %2493 = vmatmul.mubr.bf16.gmra.mrb[4].mxu0 %v1223_v52  ;;  %2525 = vmatmul.mubr.bf16.gmra.mrb[4].mxu1 %v1239_v53  ;;  %v1186_v52 = vld [vmem:[#allocation2 + $0xf0] sm:$0xff]  ;;  %v1187_v53 = vld [vmem:[#allocation2 + $0xf8] sm:$0xff] }
 0x20d   :  { %2496 = vmatprep.mubr.bf16.mxu0 %v1224_v54  ;;  %2528 = vmatprep.mubr.bf16.mxu1 %v1240_v55  ;;  %v1218_v54 = vld [vmem:[#allocation2 + $0x1f0] sm:$0xff]  ;;  %v1219_v55 = vld [vmem:[#allocation2 + $0x1f8] sm:$0xff]  ;;  %v1235_v56 = vpack.c.bf16 %v1187_v53, %v1186_v52 }
 0x20e   :  { %v1251_v57 = vpack.c.bf16 %v1219_v55, %v1218_v54 }
 0x214   :  { %2497 = vmatmul.mubr.bf16.gmra.mrb[8].mxu0 %v1225_v0  ;;  %2529 = vmatmul.mubr.bf16.gmra.mrb[8].mxu1 %v1241_v1 }
 0x215   :  { %2500 = vmatprep.mubr.bf16.mxu0 %v1226_v2  ;;  %2532 = vmatprep.mubr.bf16.mxu1 %v1242_v3 }
 0x21c   :  { %2501 = vmatmul.mubr.bf16.gmra.mrb[12].mxu0 %v1227_v12  ;;  %2533 = vmatmul.mubr.bf16.gmra.mrb[12].mxu1 %v1243_v13 }
 0x21d   :  { %2504 = vmatprep.mubr.bf16.mxu0 %v1228_v14  ;;  %2536 = vmatprep.mubr.bf16.mxu1 %v1244_v15 }
 0x224   :  { %2505 = vmatmul.mubr.bf16.gmra.mrb[16].mxu0 %v1229_v24  ;;  %2537 = vmatmul.mubr.bf16.gmra.mrb[16].mxu1 %v1245_v25 }
 0x225   :  { %2508 = vmatprep.mubr.bf16.mxu0 %v1230_v26  ;;  %2540 = vmatprep.mubr.bf16.mxu1 %v1246_v27 }
 0x22c   :  { %2509 = vmatmul.mubr.bf16.gmra.mrb[20].mxu0 %v1231_v36  ;;  %2541 = vmatmul.mubr.bf16.gmra.mrb[20].mxu1 %v1247_v37 }
 0x22d   :  { %2512 = vmatprep.mubr.bf16.mxu0 %v1232_v38  ;;  %2544 = vmatprep.mubr.bf16.mxu1 %v1248_v39 }
 0x234   :  { %2513 = vmatmul.mubr.bf16.gmra.mrb[24].mxu0 %v1233_v48  ;;  %2545 = vmatmul.mubr.bf16.gmra.mrb[24].mxu1 %v1249_v49 }
 0x235   :  { %2516 = vmatprep.mubr.bf16.mxu0 %v1234_v50  ;;  %2548 = vmatprep.mubr.bf16.mxu1 %v1250_v51 }
 0x23c   :  { %2517 = vmatmul.mubr.bf16.gmra.mrb[28].mxu0 %v1235_v56  ;;  %2549 = vmatmul.mubr.bf16.gmra.mrb[28].mxu1 %v1251_v57 }
 0x2d7   :  { %v2490_v59 = vpop.f32.mrb[0].mxu0  ;;  %v2522_v60 = vpop.f32.mrb[0].mxu1 }
 0x2d8   :  { %v1366_v61 = vadd.f32 %v2490_v59, %v3051_v58  ;;  %v1494_v62 = vadd.f32 %v2522_v60, %v3051_v58  ;;  %v1357_v63 = vpop.f32.mrb[1].mxu0  ;;  %v1485_v0 = vpop.f32.mrb[1].mxu1 }
 0x2d9   :  { %v1358_v1 = vadd.f32 %v3051_v58, %v1357_v63  ;;  %v1486_v2 = vadd.f32 %v3051_v58, %v1485_v0  ;;  %v2491_v3 = vpop.f32.mrb[2].mxu0  ;;  %v2523_v4 = vpop.f32.mrb[2].mxu1 }
 0x2da   :  { %v1369_v5 = vadd.f32 %v2491_v3, %v3051_v58  ;;  %v1497_v6 = vadd.f32 %v2523_v4, %v3051_v58  ;;  %v1360_v7 = vpop.f32.mrb[3].mxu0  ;;  %v1488_v8 = vpop.f32.mrb[3].mxu1  ;;  %v1614_v11 = vmax.f32 %v1366_v61, 0.0  ;;  %v1646_v12 = vmax.f32 %v1494_v62, 0.0 }
 0x2db   :  { %v1361_v9 = vadd.f32 %v3051_v58, %v1360_v7  ;;  %v1489_v10 = vadd.f32 %v3051_v58, %v1488_v8  ;;  %v1612_v15 = vmax.f32 %v1358_v1, 0.0  ;;  %v1644_v16 = vmax.f32 %v1486_v2, 0.0 }
 0x2dc   :  { %v1615_v13 = vmax.f32 %v1369_v5, 0.0  ;;  %v1647_v14 = vmax.f32 %v1497_v6, 0.0 }
 0x2dd   :  { %v1613_v17 = vmax.f32 %v1361_v9, 0.0  ;;  %v1645_v18 = vmax.f32 %v1489_v10, 0.0 }
 0x2de   :  { %v2249_v19 = vpack.c.bf16 %v1615_v13, %v1614_v11  ;;  %v2329_v20 = vpack.c.bf16 %v1647_v14, %v1646_v12 }
 0x2df   :  { %v2244_v21 = vpack.c.bf16 %v1613_v17, %v1612_v15  ;;  %v2324_v22 = vpack.c.bf16 %v1645_v18, %v1644_v16  ;;  %v2494_v23 = vpop.f32.mrb[4].mxu0  ;;  %v2526_v24 = vpop.f32.mrb[4].mxu1 }
 0x2e0   :  { %2401 = vst [vmem:[#allocation12 + $0x8] sm:$0xff] %v2249_v19   ;;  %2417 = vst [vmem:[#allocation12 + $0x88] sm:$0xff] %v2329_v20   ;;  %v1382_v25 = vadd.f32 %v2494_v23, %v3051_v58  ;;  %v1510_v26 = vadd.f32 %v2526_v24, %v3051_v58  ;;  %v1373_v27 = vpop.f32.mrb[5].mxu0  ;;  %v1501_v28 = vpop.f32.mrb[5].mxu1 }
 0x2e1   :  { %2245 = vst [vmem:[#allocation12] sm:$0xff] %v2244_v21   ;;  %2416 = vst [vmem:[#allocation12 + $0x80] sm:$0xff] %v2324_v22   ;;  %v1374_v29 = vadd.f32 %v3051_v58, %v1373_v27  ;;  %v1502_v30 = vadd.f32 %v3051_v58, %v1501_v28  ;;  %v2495_v31 = vpop.f32.mrb[6].mxu0  ;;  %v2527_v32 = vpop.f32.mrb[6].mxu1 }
 0x2e2   :  { %v1385_v33 = vadd.f32 %v2495_v31, %v3051_v58  ;;  %v1513_v34 = vadd.f32 %v2527_v32, %v3051_v58  ;;  %v1376_v35 = vpop.f32.mrb[7].mxu0  ;;  %v1504_v36 = vpop.f32.mrb[7].mxu1  ;;  %v1618_v39 = vmax.f32 %v1382_v25, 0.0  ;;  %v1650_v40 = vmax.f32 %v1510_v26, 0.0 }
 0x2e3   :  { %v1377_v37 = vadd.f32 %v3051_v58, %v1376_v35  ;;  %v1505_v38 = vadd.f32 %v3051_v58, %v1504_v36  ;;  %v1616_v43 = vmax.f32 %v1374_v29, 0.0  ;;  %v1648_v44 = vmax.f32 %v1502_v30, 0.0 }
 0x2e4   :  { %v1619_v41 = vmax.f32 %v1385_v33, 0.0  ;;  %v1651_v42 = vmax.f32 %v1513_v34, 0.0 }
 0x2e5   :  { %v1617_v45 = vmax.f32 %v1377_v37, 0.0  ;;  %v1649_v46 = vmax.f32 %v1505_v38, 0.0 }
 0x2e6   :  { %v2259_v47 = vpack.c.bf16 %v1619_v41, %v1618_v39  ;;  %v2339_v48 = vpack.c.bf16 %v1651_v42, %v1650_v40 }
 0x2e7   :  { %v2254_v49 = vpack.c.bf16 %v1617_v45, %v1616_v43  ;;  %v2334_v50 = vpack.c.bf16 %v1649_v46, %v1648_v44  ;;  %v2498_v51 = vpop.f32.mrb[8].mxu0  ;;  %v2530_v52 = vpop.f32.mrb[8].mxu1 }
 0x2e8   :  { %2403 = vst [vmem:[#allocation12 + $0x18] sm:$0xff] %v2259_v47   ;;  %2419 = vst [vmem:[#allocation12 + $0x98] sm:$0xff] %v2339_v48   ;;  %v1398_v53 = vadd.f32 %v2498_v51, %v3051_v58  ;;  %v1526_v54 = vadd.f32 %v2530_v52, %v3051_v58  ;;  %v1389_v55 = vpop.f32.mrb[9].mxu0  ;;  %v1517_v56 = vpop.f32.mrb[9].mxu1 }
 0x2e9   :  { %2402 = vst [vmem:[#allocation12 + $0x10] sm:$0xff] %v2254_v49   ;;  %2418 = vst [vmem:[#allocation12 + $0x90] sm:$0xff] %v2334_v50   ;;  %v1390_v57 = vadd.f32 %v3051_v58, %v1389_v55  ;;  %v1518_v59 = vadd.f32 %v3051_v58, %v1517_v56  ;;  %v2499_v60 = vpop.f32.mrb[10].mxu0  ;;  %v2531_v61 = vpop.f32.mrb[10].mxu1 }
 0x2ea   :  { %v1401_v62 = vadd.f32 %v2499_v60, %v3051_v58  ;;  %v1529_v63 = vadd.f32 %v2531_v61, %v3051_v58  ;;  %v1392_v0 = vpop.f32.mrb[11].mxu0  ;;  %v1520_v1 = vpop.f32.mrb[11].mxu1  ;;  %v1622_v4 = vmax.f32 %v1398_v53, 0.0  ;;  %v1654_v5 = vmax.f32 %v1526_v54, 0.0 }
 0x2eb   :  { %v1393_v2 = vadd.f32 %v3051_v58, %v1392_v0  ;;  %v1521_v3 = vadd.f32 %v3051_v58, %v1520_v1  ;;  %v1620_v8 = vmax.f32 %v1390_v57, 0.0  ;;  %v1652_v9 = vmax.f32 %v1518_v59, 0.0 }
 0x2ec   :  { %v1623_v6 = vmax.f32 %v1401_v62, 0.0  ;;  %v1655_v7 = vmax.f32 %v1529_v63, 0.0 }
 0x2ed   :  { %v1621_v10 = vmax.f32 %v1393_v2, 0.0  ;;  %v1653_v11 = vmax.f32 %v1521_v3, 0.0 }
 0x2ee   :  { %v2269_v12 = vpack.c.bf16 %v1623_v6, %v1622_v4  ;;  %v2349_v13 = vpack.c.bf16 %v1655_v7, %v1654_v5 }
 0x2ef   :  { %v2264_v14 = vpack.c.bf16 %v1621_v10, %v1620_v8  ;;  %v2344_v15 = vpack.c.bf16 %v1653_v11, %v1652_v9  ;;  %v2502_v16 = vpop.f32.mrb[12].mxu0  ;;  %v2534_v17 = vpop.f32.mrb[12].mxu1 }
 0x2f0   :  { %2405 = vst [vmem:[#allocation12 + $0x28] sm:$0xff] %v2269_v12   ;;  %2421 = vst [vmem:[#allocation12 + $0xa8] sm:$0xff] %v2349_v13   ;;  %v1414_v18 = vadd.f32 %v2502_v16, %v3051_v58  ;;  %v1542_v19 = vadd.f32 %v2534_v17, %v3051_v58  ;;  %v1405_v20 = vpop.f32.mrb[13].mxu0  ;;  %v1533_v21 = vpop.f32.mrb[13].mxu1 }
 0x2f1   :  { %2404 = vst [vmem:[#allocation12 + $0x20] sm:$0xff] %v2264_v14   ;;  %2420 = vst [vmem:[#allocation12 + $0xa0] sm:$0xff] %v2344_v15   ;;  %v1406_v22 = vadd.f32 %v3051_v58, %v1405_v20  ;;  %v1534_v23 = vadd.f32 %v3051_v58, %v1533_v21  ;;  %v2503_v24 = vpop.f32.mrb[14].mxu0  ;;  %v2535_v25 = vpop.f32.mrb[14].mxu1 }
 0x2f2   :  { %v1417_v26 = vadd.f32 %v2503_v24, %v3051_v58  ;;  %v1545_v27 = vadd.f32 %v2535_v25, %v3051_v58  ;;  %v1408_v28 = vpop.f32.mrb[15].mxu0  ;;  %v1536_v29 = vpop.f32.mrb[15].mxu1  ;;  %v1626_v32 = vmax.f32 %v1414_v18, 0.0  ;;  %v1658_v33 = vmax.f32 %v1542_v19, 0.0 }
 0x2f3   :  { %v1409_v30 = vadd.f32 %v3051_v58, %v1408_v28  ;;  %v1537_v31 = vadd.f32 %v3051_v58, %v1536_v29  ;;  %v1624_v36 = vmax.f32 %v1406_v22, 0.0  ;;  %v1656_v37 = vmax.f32 %v1534_v23, 0.0 }
 0x2f4   :  { %v1627_v34 = vmax.f32 %v1417_v26, 0.0  ;;  %v1659_v35 = vmax.f32 %v1545_v27, 0.0 }
 0x2f5   :  { %v1625_v38 = vmax.f32 %v1409_v30, 0.0  ;;  %v1657_v39 = vmax.f32 %v1537_v31, 0.0 }
 0x2f6   :  { %v2279_v40 = vpack.c.bf16 %v1627_v34, %v1626_v32  ;;  %v2359_v41 = vpack.c.bf16 %v1659_v35, %v1658_v33 }
 0x2f7   :  { %v2274_v42 = vpack.c.bf16 %v1625_v38, %v1624_v36  ;;  %v2354_v43 = vpack.c.bf16 %v1657_v39, %v1656_v37  ;;  %v2506_v44 = vpop.f32.mrb[16].mxu0  ;;  %v2538_v45 = vpop.f32.mrb[16].mxu1 }
 0x2f8   :  { %2407 = vst [vmem:[#allocation12 + $0x38] sm:$0xff] %v2279_v40   ;;  %2423 = vst [vmem:[#allocation12 + $0xb8] sm:$0xff] %v2359_v41   ;;  %v1430_v46 = vadd.f32 %v2506_v44, %v3051_v58  ;;  %v1558_v47 = vadd.f32 %v2538_v45, %v3051_v58  ;;  %v1421_v48 = vpop.f32.mrb[17].mxu0  ;;  %v1549_v49 = vpop.f32.mrb[17].mxu1 }
 0x2f9   :  { %2406 = vst [vmem:[#allocation12 + $0x30] sm:$0xff] %v2274_v42   ;;  %2422 = vst [vmem:[#allocation12 + $0xb0] sm:$0xff] %v2354_v43   ;;  %v1422_v50 = vadd.f32 %v3051_v58, %v1421_v48  ;;  %v1550_v51 = vadd.f32 %v3051_v58, %v1549_v49  ;;  %v2507_v52 = vpop.f32.mrb[18].mxu0  ;;  %v2539_v53 = vpop.f32.mrb[18].mxu1 }
 0x2fa   :  { %v1433_v54 = vadd.f32 %v2507_v52, %v3051_v58  ;;  %v1561_v55 = vadd.f32 %v2539_v53, %v3051_v58  ;;  %v1424_v56 = vpop.f32.mrb[19].mxu0  ;;  %v1552_v57 = vpop.f32.mrb[19].mxu1  ;;  %v1630_v61 = vmax.f32 %v1430_v46, 0.0  ;;  %v1662_v62 = vmax.f32 %v1558_v47, 0.0 }
 0x2fb   :  { %v1425_v59 = vadd.f32 %v3051_v58, %v1424_v56  ;;  %v1553_v60 = vadd.f32 %v3051_v58, %v1552_v57  ;;  %v1628_v1 = vmax.f32 %v1422_v50, 0.0  ;;  %v1660_v2 = vmax.f32 %v1550_v51, 0.0 }
 0x2fc   :  { %v1631_v63 = vmax.f32 %v1433_v54, 0.0  ;;  %v1663_v0 = vmax.f32 %v1561_v55, 0.0 }
 0x2fd   :  { %v1629_v3 = vmax.f32 %v1425_v59, 0.0  ;;  %v1661_v4 = vmax.f32 %v1553_v60, 0.0 }
 0x2fe   :  { %v2289_v5 = vpack.c.bf16 %v1631_v63, %v1630_v61  ;;  %v2369_v6 = vpack.c.bf16 %v1663_v0, %v1662_v62 }
 0x2ff   :  { %v2284_v7 = vpack.c.bf16 %v1629_v3, %v1628_v1  ;;  %v2364_v8 = vpack.c.bf16 %v1661_v4, %v1660_v2  ;;  %v2510_v9 = vpop.f32.mrb[20].mxu0  ;;  %v2542_v10 = vpop.f32.mrb[20].mxu1 }
 0x300   :  { %2409 = vst [vmem:[#allocation12 + $0x48] sm:$0xff] %v2289_v5   ;;  %2425 = vst [vmem:[#allocation12 + $0xc8] sm:$0xff] %v2369_v6   ;;  %v1446_v11 = vadd.f32 %v2510_v9, %v3051_v58  ;;  %v1574_v12 = vadd.f32 %v2542_v10, %v3051_v58  ;;  %v1437_v13 = vpop.f32.mrb[21].mxu0  ;;  %v1565_v14 = vpop.f32.mrb[21].mxu1 }
 0x301   :  { %2408 = vst [vmem:[#allocation12 + $0x40] sm:$0xff] %v2284_v7   ;;  %2424 = vst [vmem:[#allocation12 + $0xc0] sm:$0xff] %v2364_v8   ;;  %v1438_v15 = vadd.f32 %v3051_v58, %v1437_v13  ;;  %v1566_v16 = vadd.f32 %v3051_v58, %v1565_v14  ;;  %v2511_v17 = vpop.f32.mrb[22].mxu0  ;;  %v2543_v18 = vpop.f32.mrb[22].mxu1 }
 0x302   :  { %v1449_v19 = vadd.f32 %v2511_v17, %v3051_v58  ;;  %v1577_v20 = vadd.f32 %v2543_v18, %v3051_v58  ;;  %v1440_v21 = vpop.f32.mrb[23].mxu0  ;;  %v1568_v22 = vpop.f32.mrb[23].mxu1  ;;  %v1634_v25 = vmax.f32 %v1446_v11, 0.0  ;;  %v1666_v26 = vmax.f32 %v1574_v12, 0.0 }
 0x303   :  { %v1441_v23 = vadd.f32 %v3051_v58, %v1440_v21  ;;  %v1569_v24 = vadd.f32 %v3051_v58, %v1568_v22  ;;  %v1632_v29 = vmax.f32 %v1438_v15, 0.0  ;;  %v1664_v30 = vmax.f32 %v1566_v16, 0.0 }
 0x304   :  { %v1635_v27 = vmax.f32 %v1449_v19, 0.0  ;;  %v1667_v28 = vmax.f32 %v1577_v20, 0.0 }
 0x305   :  { %v1633_v31 = vmax.f32 %v1441_v23, 0.0  ;;  %v1665_v32 = vmax.f32 %v1569_v24, 0.0 }
 0x306   :  { %v2299_v33 = vpack.c.bf16 %v1635_v27, %v1634_v25  ;;  %v2379_v34 = vpack.c.bf16 %v1667_v28, %v1666_v26 }
 0x307   :  { %v2294_v35 = vpack.c.bf16 %v1633_v31, %v1632_v29  ;;  %v2374_v36 = vpack.c.bf16 %v1665_v32, %v1664_v30  ;;  %v2514_v37 = vpop.f32.mrb[24].mxu0  ;;  %v2546_v38 = vpop.f32.mrb[24].mxu1 }
 0x308   :  { %2411 = vst [vmem:[#allocation12 + $0x58] sm:$0xff] %v2299_v33   ;;  %2427 = vst [vmem:[#allocation12 + $0xd8] sm:$0xff] %v2379_v34   ;;  %v1462_v39 = vadd.f32 %v2514_v37, %v3051_v58  ;;  %v1590_v40 = vadd.f32 %v2546_v38, %v3051_v58  ;;  %v1453_v41 = vpop.f32.mrb[25].mxu0  ;;  %v1581_v42 = vpop.f32.mrb[25].mxu1 }
 0x309   :  { %2410 = vst [vmem:[#allocation12 + $0x50] sm:$0xff] %v2294_v35   ;;  %2426 = vst [vmem:[#allocation12 + $0xd0] sm:$0xff] %v2374_v36   ;;  %v1454_v43 = vadd.f32 %v3051_v58, %v1453_v41  ;;  %v1582_v44 = vadd.f32 %v3051_v58, %v1581_v42  ;;  %v2515_v45 = vpop.f32.mrb[26].mxu0  ;;  %v2547_v46 = vpop.f32.mrb[26].mxu1 }
 0x30a   :  { %v1465_v47 = vadd.f32 %v2515_v45, %v3051_v58  ;;  %v1593_v48 = vadd.f32 %v2547_v46, %v3051_v58  ;;  %v1456_v49 = vpop.f32.mrb[27].mxu0  ;;  %v1584_v50 = vpop.f32.mrb[27].mxu1  ;;  %v1638_v53 = vmax.f32 %v1462_v39, 0.0  ;;  %v1670_v54 = vmax.f32 %v1590_v40, 0.0 }
 0x30b   :  { %v1457_v51 = vadd.f32 %v3051_v58, %v1456_v49  ;;  %v1585_v52 = vadd.f32 %v3051_v58, %v1584_v50  ;;  %v1636_v57 = vmax.f32 %v1454_v43, 0.0  ;;  %v1668_v59 = vmax.f32 %v1582_v44, 0.0 }
 0x30c   :  { %v1639_v55 = vmax.f32 %v1465_v47, 0.0  ;;  %v1671_v56 = vmax.f32 %v1593_v48, 0.0 }
 0x30d   :  { %v1637_v60 = vmax.f32 %v1457_v51, 0.0  ;;  %v1669_v61 = vmax.f32 %v1585_v52, 0.0 }
 0x30e   :  { %v2309_v62 = vpack.c.bf16 %v1639_v55, %v1638_v53  ;;  %v2389_v63 = vpack.c.bf16 %v1671_v56, %v1670_v54 }
 0x30f   :  { %v2304_v0 = vpack.c.bf16 %v1637_v60, %v1636_v57  ;;  %v2384_v1 = vpack.c.bf16 %v1669_v61, %v1668_v59  ;;  %v2518_v2 = vpop.f32.mrb[28].mxu0  ;;  %v2550_v3 = vpop.f32.mrb[28].mxu1 }
 0x310   :  { %2413 = vst [vmem:[#allocation12 + $0x68] sm:$0xff] %v2309_v62   ;;  %2429 = vst [vmem:[#allocation12 + $0xe8] sm:$0xff] %v2389_v63   ;;  %v1478_v4 = vadd.f32 %v2518_v2, %v3051_v58  ;;  %v1606_v5 = vadd.f32 %v2550_v3, %v3051_v58  ;;  %v1469_v6 = vpop.f32.mrb[29].mxu0  ;;  %v1597_v7 = vpop.f32.mrb[29].mxu1 }
 0x311   :  { %2412 = vst [vmem:[#allocation12 + $0x60] sm:$0xff] %v2304_v0   ;;  %2428 = vst [vmem:[#allocation12 + $0xe0] sm:$0xff] %v2384_v1   ;;  %v1470_v8 = vadd.f32 %v3051_v58, %v1469_v6  ;;  %v1598_v9 = vadd.f32 %v3051_v58, %v1597_v7  ;;  %v2519_v10 = vpop.f32.mrb[30].mxu0  ;;  %v2551_v11 = vpop.f32.mrb[30].mxu1 }
 0x312   :  { %v1481_v12 = vadd.f32 %v2519_v10, %v3051_v58  ;;  %v1609_v13 = vadd.f32 %v2551_v11, %v3051_v58  ;;  %v1472_v14 = vpop.f32.mrb[31].mxu0  ;;  %v1600_v15 = vpop.f32.mrb[31].mxu1  ;;  %v1642_v18 = vmax.f32 %v1478_v4, 0.0  ;;  %v1674_v19 = vmax.f32 %v1606_v5, 0.0 }
 0x313   :  { %v1473_v16 = vadd.f32 %v3051_v58, %v1472_v14  ;;  %v1601_v17 = vadd.f32 %v3051_v58, %v1600_v15  ;;  %v1640_v22 = vmax.f32 %v1470_v8, 0.0  ;;  %v1672_v23 = vmax.f32 %v1598_v9, 0.0 }
 0x314   :  { %v1643_v20 = vmax.f32 %v1481_v12, 0.0  ;;  %v1675_v21 = vmax.f32 %v1609_v13, 0.0 }
 0x315   :  { %v1641_v24 = vmax.f32 %v1473_v16, 0.0  ;;  %v1673_v25 = vmax.f32 %v1601_v17, 0.0 }
 0x316   :  { %v2319_v26 = vpack.c.bf16 %v1643_v20, %v1642_v18  ;;  %v2399_v27 = vpack.c.bf16 %v1675_v21, %v1674_v19 }
 0x317   :  { %v2314_v28 = vpack.c.bf16 %v1641_v24, %v1640_v22  ;;  %v2394_v29 = vpack.c.bf16 %v1673_v25, %v1672_v23 }
 0x318   :  { %2415 = vst [vmem:[#allocation12 + $0x78] sm:$0xff] %v2319_v26   ;;  %2431 = vst [vmem:[#allocation12 + $0xf8] sm:$0xff] %v2399_v27  }
 0x319   :  { %2414 = vst [vmem:[#allocation12 + $0x70] sm:$0xff] %v2314_v28   ;;  %2430 = vst [vmem:[#allocation12 + $0xf0] sm:$0xff] %v2394_v29  }
 0x31a   :  { %2810 = shalt.err (!%p2807_p6)
}
 0x31b   :  { %s2811_s8 = scalar_lea.hbm %s3138_s6, 4096 }
 0x31c   :  { %p2812_p7 = scmp.ne.s32.totalorder %s3138_s6, %s2811_s8  ;;  %p2815_p8 = scmp.lt.u32.totalorder %s2811_s8, %s3138_s6 }
 0x31e   :  { %p2817_p9 = pnand %p2815_p8, %p2812_p7 }
 0x320   :  { %2820 = shalt.err (!%p2817_p9)
}
 0x321   :  { %2007 = dma.vmem_to_hbm [thread:$0]  %s2002_s28, 4096, %s3138_s6, [#allocation8], %s2828_s9, %s2828_s9, %s2829_s10  }
 0x322   :  { %2825 = dma.done.wait [#allocation8], 4096  }
 0x323   :  { %2826 = vsyncadd [#allocation8], 4294963200 }
 0x324   :  { %2011 = vsyncpa [#allocation7], 1 }
 0x325   :  { %2012 = vsyncpa [#allocation10], 1 }
 0x326   :  { %2013 = vsyncpa [#allocation8], 1 }

</bundles_post_ra>
